<compile_context>
chip_gen: v7x
topology: tpu7x:2x2x1
jax: 0.10.0
libtpu: 0.0.40
codegen_flags: <defaults>
</compile_context>

<pallas_src>
import math
from functools import partial

import jax
import jax.numpy as jnp
from jax.experimental import pallas as pl
from jax.experimental.pallas import tpu as pltpu

NEG_SLOPE = 0.01   # nn.LeakyReLU default negative slope
BN_EPS = 1e-5      # nn.BatchNorm2d default eps


# ---------------------------------------------------------------------------
# Tiling helpers (explicit VMEM budgeting, v5e/v6e/v7x safe)
# ---------------------------------------------------------------------------
def _rup(a, m):
    return ((a + m - 1) // m) * m


def _vmem_block_bytes(br, tho, wp, wo, c1, c2, k):
    """Rough per-step VMEM footprint with (sublane, lane) tile padding."""
    in_blk = br * _rup(c1, 16) * _rup(wp, 128) * 2            # bf16 input block
    out_blk = c2 * _rup(tho, 8) * _rup(wo, 128) * 4           # f32 output block
    win = (br + 2 * k) * _rup(c1, 16) * _rup(wp, 128) * 2     # assembled window
    ycat = (tho + 1) * _rup(c2, 8) * _rup(wp, 128) * 4        # in-VMEM ycat rows
    return 2 * (2 * in_blk) + 2 * out_blk + win + ycat        # 2x = double buffer


def _pick_tile_rows(ho, s, k, n_batch, wp, wo, c1, c2, budget=12 << 20):
    """Output-row tile: divides Ho, big enough to contain the 2k-row input halo
    in one neighbouring block, sublane-aligned stores, fits the VMEM budget,
    and keeps >= 4 total grid steps when possible (v7x dual-TC pipelining)."""
    cands = []
    for d in range(1, ho + 1):
        if ho % d:
            continue
        if d * s < 2 * k:                       # halo must fit in the next block
            continue
        if d % 8 and d != ho:                   # output sublane-store constraint
            continue
        if _vmem_block_bytes(d * s, d, wp, wo, c1, c2, k) > budget:
            continue
        cands.append(d)
    if not cands:
        return ho
    deep = [d for d in cands if n_batch * (ho // d) >= 4]
    return max(deep) if deep else max(cands)


# ---------------------------------------------------------------------------
# Weight preparation: fold BN scale into weights (transposed layout)
# ---------------------------------------------------------------------------
def _fold_bn_t(w, gamma, beta, mean, var):
    """w: (Cout, Cin, kh, kw) -> (Cout, kh*kw*Cin) * bn_scale, plus bn_shift."""
    cout = w.shape[0]
    scale = gamma / jnp.sqrt(var + BN_EPS)
    shift = beta - mean * scale
    w_t = jnp.transpose(w, (0, 2, 3, 1)).reshape(cout, -1)    # cols: (kh, kw, cin)
    return w_t * scale[:, None], shift


# ---------------------------------------------------------------------------
# Fused PConv kernel
# ---------------------------------------------------------------------------
def _make_pconv_kernel(*, k, s, tho, wb, wo, c1, c4, c2):
    nrow = tho + 1            # ycat rows per tile (incl. one halo row for 2x2 conv)
    two_k = 2 * k
    span = (wb - 1) * s + 1   # input-column span per tap row

    def leaky(v):
        return jnp.where(v >= 0, v, NEG_SLOPE * v)

    def kernel(xa_ref, xb_ref, wcw_ref, wch_ref, b1_ref, wcat_ref, b2_ref, o_ref):
        # Input row window for this tile: (BR + 2k, c1, Wp) bf16 — own block
        # plus a 2k-row halo taken from the start of the next block.
        xw = jnp.concatenate([xa_ref[0], xb_ref[0, :two_k]], axis=0)
        wcw = wcw_ref[...]          # (c4, k*c1)   bf16
        wch = wch_ref[...]          # (c4, k*c1)   bf16
        wcat = wcat_ref[...]        # (c2, 4*c2)   f32
        b1 = b1_ref[...]            # (c2, 1)      f32
        b2 = b2_ref[...]            # (c2, 1)      f32

        def tap(row, col0):
            # One conv tap across all output columns: (c1, Wb).
            return xw[row, :, col0:col0 + span:s]

        # ---- stage 1: all four pinwheel branches, one ycat row at a time ----
        ycat = []                                            # (c2, Wb) f32, in VMEM
        for r in range(nrow):
            # cw (1 x k): the two pad offsets (yw0, yw1) share one matmul.
            lw = jnp.concatenate(
                [jnp.concatenate([tap(k - 1 + r * s, dj) for dj in range(k)], axis=0),
                 jnp.concatenate([tap(k + r * s, k + dj) for dj in range(k)], axis=0)],
                axis=1)                                      # (k*c1, 2*Wb)
            yw = jnp.dot(wcw, lw, preferred_element_type=jnp.float32)   # (c4, 2*Wb)
            # ch (k x 1): the two pad offsets (yh0, yh1) share one matmul.
            lh = jnp.concatenate(
                [jnp.concatenate([tap(di + r * s, k) for di in range(k)], axis=0),
                 jnp.concatenate([tap(k + di + r * s, k - 1) for di in range(k)], axis=0)],
                axis=1)                                      # (k*c1, 2*Wb)
            yh = jnp.dot(wch, lh, preferred_element_type=jnp.float32)   # (c4, 2*Wb)
            # Channel order matches torch.cat([yw0, yw1, yh0, yh1], dim=1).
            raw = jnp.concatenate(
                [yw[:, :wb], yw[:, wb:], yh[:, :wb], yh[:, wb:]], axis=0)  # (c2, Wb)
            ycat.append(leaky(raw + b1))

        # ---- stage 2: 2x2 "cat" conv over the in-VMEM ycat rows ----
        rows = []
        for ho in range(tho):
            top, bot = ycat[ho], ycat[ho + 1]
            lhs = jnp.concatenate(
                [top[:, 0:wo], top[:, 1:wo + 1], bot[:, 0:wo], bot[:, 1:wo + 1]],
                axis=0)                                      # (4*c2, Wo)
            y = jnp.dot(wcat, lhs, preferred_element_type=jnp.float32)  # (c2, Wo)
            rows.append(leaky(y + b2))

        # NCHW tile written directly (no transpose op anywhere).
        o_ref[0] = jnp.stack(rows, axis=1).astype(o_ref.dtype)          # (c2, tho, Wo)

    return kernel


# ---------------------------------------------------------------------------
# PConv forward — single fused pallas_call
# ---------------------------------------------------------------------------
@partial(jax.jit, static_argnums=(2, 3))
def pconv_forward(x_nchw, params, k, s):
    n, c1, h, w = x_nchw.shape
    c4 = params["cw"][0].shape[0]
    c2 = 4 * c4
    assert h % s == 0 and w % s == 0
    hb, wb = h // s + 1, w // s + 1          # branch (ycat) spatial size
    ho, wo = hb - 1, wb - 1                  # final output spatial size
    wp = w + 2 * k                           # universally padded width

    tho = _pick_tile_rows(ho, s, k, n, wp, wo, c1, c2)
    br = tho * s                             # input rows per output-row tile
    assert ho % tho == 0 and (tho % 8 == 0 or tho == ho)
    assert br >= 2 * k, "row tile too small to contain the input halo"
    n_tiles = ho // tho
    hrows = (n_tiles + 1) * br               # n_tiles*br == H; +1 block for the halo

    # NCHW -> (N, H, C, W) so W is the lane dim everywhere; bf16; single pad.
    x = jnp.transpose(x_nchw, (0, 2, 1, 3)).astype(jnp.bfloat16)
    xp = jnp.pad(x, ((0, 0), (k, hrows - h - k), (0, 0), (k, k)))

    # Fold BN (inference) into weights; transposed (Cout, k*Cin) layout.
    wcw, bcw = _fold_bn_t(*params["cw"])     # (c4, k*c1)
    wch, bch = _fold_bn_t(*params["ch"])     # (c4, k*c1)
    wcat, bct = _fold_bn_t(*params["cat"])   # (c2, 4*c2)
    b1 = jnp.concatenate([bcw, bcw, bch, bch]).reshape(c2, 1).astype(jnp.float32)
    b2 = bct.reshape(c2, 1).astype(jnp.float32)
    wcw = wcw.astype(jnp.bfloat16)
    wch = wch.astype(jnp.bfloat16)
    wcat = wcat.astype(jnp.float32)          # stage-2 kept in f32 for accuracy

    kernel = _make_pconv_kernel(k=k, s=s, tho=tho, wb=wb, wo=wo, c1=c1, c4=c4, c2=c2)

    est = _vmem_block_bytes(br, tho, wp, wo, c1, c2, k)
    cost = pl.CostEstimate(
        flops=2 * n * (hb * wb * 4 * c4 * k * c1 + ho * wo * c2 * 4 * c2),
        transcendentals=0,
        bytes_accessed=2 * xp.size * 2 + n * c2 * ho * wo * 4,
    )

    out = pl.pallas_call(
        kernel,
        out_shape=jax.ShapeDtypeStruct((n, c2, ho, wo), jnp.float32),
        grid_spec=pltpu.PrefetchScalarGridSpec(
            num_scalar_prefetch=0,
            grid=(n, n_tiles),
            in_specs=[
                pl.BlockSpec((1, br, c1, wp), lambda b, i: (b, i, 0, 0)),      # own rows
                pl.BlockSpec((1, br, c1, wp), lambda b, i: (b, i + 1, 0, 0)),  # halo rows
                pl.BlockSpec((c4, k * c1), lambda b, i: (0, 0)),               # cw weight
                pl.BlockSpec((c4, k * c1), lambda b, i: (0, 0)),               # ch weight
                pl.BlockSpec((c2, 1), lambda b, i: (0, 0)),                    # branch bias
                pl.BlockSpec((c2, 4 * c2), lambda b, i: (0, 0)),               # cat weight
                pl.BlockSpec((c2, 1), lambda b, i: (0, 0)),                    # cat bias
            ],
            out_specs=pl.BlockSpec((1, c2, tho, wo), lambda b, i: (b, 0, i, 0)),
        ),
        compiler_params=pltpu.CompilerParams(
            dimension_semantics=("parallel", "parallel"),
            vmem_limit_bytes=int(min(max(4 * est, 8 << 20), 48 << 20)),
        ),
        cost_estimate=cost,
    )(xp, xp, wcw, wch, b1, wcat, b2)
    return out                                # already NCHW f32


# ---------------------------------------------------------------------------
# Pure-JAX reference (mirrors the PyTorch module) for numerical validation
# ---------------------------------------------------------------------------
def _convx_ref(x_nchw, w, gamma, beta, mean, var, stride):
    y = jax.lax.conv_general_dilated(
        x_nchw, w, window_strides=(stride, stride), padding="VALID",
        dimension_numbers=("NCHW", "OIHW", "NCHW"),
        precision=jax.lax.Precision.HIGHEST)
    scale = gamma / jnp.sqrt(var + BN_EPS)
    shift = beta - mean * scale
    y = y * scale[None, :, None, None] + shift[None, :, None, None]
    return jnp.where(y >= 0, y, NEG_SLOPE * y)


def pconv_reference(x_nchw, params, k, s):
    def zpad(x, p):  # (left, right, top, bottom) on NCHW
        l, r, t, b = p
        return jnp.pad(x, ((0, 0), (0, 0), (t, b), (l, r)))
    pads = [(k, 0, 1, 0), (0, k, 0, 1), (0, 1, k, 0), (1, 0, 0, k)]
    cw, ch, cat = params["cw"], params["ch"], params["cat"]
    yw0 = _convx_ref(zpad(x_nchw, pads[0]), *cw, s)
    yw1 = _convx_ref(zpad(x_nchw, pads[1]), *cw, s)
    yh0 = _convx_ref(zpad(x_nchw, pads[2]), *ch, s)
    yh1 = _convx_ref(zpad(x_nchw, pads[3]), *ch, s)
    ycat = jnp.concatenate([yw0, yw1, yh0, yh1], axis=1)
    return _convx_ref(ycat, *cat, 1)


# ---------------------------------------------------------------------------
# Deterministic parameter init (matches PConv._initialize_weights statistics)
# ---------------------------------------------------------------------------
def init_params(key, c1, c2, k):
    kcw, kch, kcat = jax.random.split(key, 3)

    def conv_w(rng, cout, cin, kh, kw):
        nfan = kh * kw * cout
        return jax.random.normal(rng, (cout, cin, kh, kw), jnp.float32) * \
            math.sqrt(2.0 / nfan)

    def bn(c):  # gamma, beta, running_mean, running_var (PyTorch defaults)
        return (jnp.ones((c,), jnp.float32), jnp.zeros((c,), jnp.float32),
                jnp.zeros((c,), jnp.float32), jnp.ones((c,), jnp.float32))

    c4 = c2 // 4
    return {
        "cw": (conv_w(kcw, c4, c1, 1, k),) + bn(c4),
        "ch": (conv_w(kch, c4, c1, k, 1),) + bn(c4),
        "cat": (conv_w(kcat, c2, c2, 2, 2),) + bn(c2),
    }


if __name__ == "__main__":
    N, C1, H, W = 2, 4, 16, 16
    C2, K, S = 8, 3, 1

    key = jax.random.PRNGKey(0)
    kx, kp = jax.random.split(key)
    x = jax.random.normal(kx, (N, C1, H, W), jnp.float32)   # NCHW input
    params = init_params(kp, C1, C2, K)

    out = pconv_forward(x, params, K, S)
    out = jax.block_until_ready(out)

    expected_shape = (N, C2, H // S, W // S)
    assert out.shape == expected_shape, (out.shape, expected_shape)
    assert bool(jnp.all(jnp.isfinite(out)))

    ref = pconv_reference(x, params, K, S)
    rel_err = float(jnp.max(jnp.abs(out - ref)) / (jnp.max(jnp.abs(ref)) + 1e-6))
    assert rel_err < 8e-2, rel_err   # bf16 branch-conv operand tolerance
    print("KERNEL_OK")
</pallas_src>

<mosaic_0001>
module attributes {stable_mosaic.version = 11 : i64} {
  func.func @kernel(%arg0: i32, %arg1: i32, %arg2: memref<1x8x4x22xbf16, #tpu.memory_space<vmem>>, %arg3: memref<1x8x4x22xbf16, #tpu.memory_space<vmem>>, %arg4: memref<2x12xbf16, #tpu.memory_space<vmem>>, %arg5: memref<2x12xbf16, #tpu.memory_space<vmem>>, %arg6: memref<8x1xf32, #tpu.memory_space<vmem>>, %arg7: memref<8x32xf32, #tpu.memory_space<vmem>>, %arg8: memref<8x1xf32, #tpu.memory_space<vmem>>, %arg9: memref<1x8x8x16xf32, #tpu.memory_space<vmem>>) attributes {dimension_semantics = [#tpu.dimension_semantics<parallel>, #tpu.dimension_semantics<parallel>], iteration_bounds = array<i64: 2, 2>, scalar_prefetch = 0 : i64, scratch_operands = 0 : i64, tpu.core_type = #tpu.core_type<tc>, window_params = [{transform_indices = @transform_0, window_bounds = array<i64: 1, 8, 4, 22>}, {transform_indices = @transform_1, window_bounds = array<i64: 1, 8, 4, 22>}, {pipeline_mode = #tpu.pipeline_mode<synchronous>, transform_indices = @transform_2, window_bounds = array<i64: 2, 12>}, {pipeline_mode = #tpu.pipeline_mode<synchronous>, transform_indices = @transform_3, window_bounds = array<i64: 2, 12>}, {pipeline_mode = #tpu.pipeline_mode<synchronous>, transform_indices = @transform_4, window_bounds = array<i64: 8, 1>}, {pipeline_mode = #tpu.pipeline_mode<synchronous>, transform_indices = @transform_5, window_bounds = array<i64: 8, 32>}, {pipeline_mode = #tpu.pipeline_mode<synchronous>, transform_indices = @transform_6, window_bounds = array<i64: 8, 1>}, {transform_indices = @transform_7, window_bounds = array<i64: 1, 8, 8, 16>}]} {
    %c0 = arith.constant 0 : index
    %c0_0 = arith.constant 0 : index
    %c0_1 = arith.constant 0 : index
    %c0_2 = arith.constant 0 : index
    %0 = vector.load %arg2[%c0, %c0_0, %c0_1, %c0_2] : memref<1x8x4x22xbf16, #tpu.memory_space<vmem>>, vector<1x8x4x22xbf16>
    %1 = vector.shape_cast %0 : vector<1x8x4x22xbf16> to vector<8x4x22xbf16>
    %c0_3 = arith.constant 0 : index
    %c0_4 = arith.constant 0 : index
    %c0_5 = arith.constant 0 : index
    %c0_6 = arith.constant 0 : index
    %2 = vector.load %arg3[%c0_3, %c0_4, %c0_5, %c0_6] : memref<1x8x4x22xbf16, #tpu.memory_space<vmem>>, vector<1x6x4x22xbf16>
    %3 = vector.shape_cast %2 : vector<1x6x4x22xbf16> to vector<6x4x22xbf16>
    %4 = tpu.concatenate %1, %3 in 0 : vector<8x4x22xbf16>, vector<6x4x22xbf16> -> vector<14x4x22xbf16>
    %c0_7 = arith.constant 0 : index
    %c0_8 = arith.constant 0 : index
    %5 = vector.load %arg4[%c0_7, %c0_8] : memref<2x12xbf16, #tpu.memory_space<vmem>>, vector<2x12xbf16>
    %c0_9 = arith.constant 0 : index
    %c0_10 = arith.constant 0 : index
    %6 = vector.load %arg5[%c0_9, %c0_10] : memref<2x12xbf16, #tpu.memory_space<vmem>>, vector<2x12xbf16>
    %c0_11 = arith.constant 0 : index
    %c0_12 = arith.constant 0 : index
    %7 = vector.load %arg7[%c0_11, %c0_12] : memref<8x32xf32, #tpu.memory_space<vmem>>, vector<8x32xf32>
    %c0_13 = arith.constant 0 : index
    %c0_14 = arith.constant 0 : index
    %8 = vector.load %arg6[%c0_13, %c0_14] : memref<8x1xf32, #tpu.memory_space<vmem>>, vector<8x1xf32>
    %c0_15 = arith.constant 0 : index
    %c0_16 = arith.constant 0 : index
    %9 = vector.load %arg8[%c0_15, %c0_16] : memref<8x1xf32, #tpu.memory_space<vmem>>, vector<8x1xf32>
    %10 = vector.extract_strided_slice %4 {offsets = [2, 0, 0], sizes = [1, 4, 17], strides = [1, 1, 1]} : vector<14x4x22xbf16> to vector<1x4x17xbf16>
    %11 = vector.shape_cast %10 : vector<1x4x17xbf16> to vector<4x17xbf16>
    %12 = vector.extract_strided_slice %4 {offsets = [2, 0, 1], sizes = [1, 4, 17], strides = [1, 1, 1]} : vector<14x4x22xbf16> to vector<1x4x17xbf16>
    %13 = vector.shape_cast %12 : vector<1x4x17xbf16> to vector<4x17xbf16>
    %14 = vector.extract_strided_slice %4 {offsets = [2, 0, 2], sizes = [1, 4, 17], strides = [1, 1, 1]} : vector<14x4x22xbf16> to vector<1x4x17xbf16>
    %15 = vector.shape_cast %14 : vector<1x4x17xbf16> to vector<4x17xbf16>
    %16 = tpu.concatenate %11, %13, %15 in 0 : vector<4x17xbf16>, vector<4x17xbf16>, vector<4x17xbf16> -> vector<12x17xbf16>
    %17 = vector.extract_strided_slice %4 {offsets = [3, 0, 3], sizes = [1, 4, 17], strides = [1, 1, 1]} : vector<14x4x22xbf16> to vector<1x4x17xbf16>
    %18 = vector.shape_cast %17 : vector<1x4x17xbf16> to vector<4x17xbf16>
    %19 = vector.extract_strided_slice %4 {offsets = [3, 0, 4], sizes = [1, 4, 17], strides = [1, 1, 1]} : vector<14x4x22xbf16> to vector<1x4x17xbf16>
    %20 = vector.shape_cast %19 : vector<1x4x17xbf16> to vector<4x17xbf16>
    %21 = vector.extract_strided_slice %4 {offsets = [3, 0, 5], sizes = [1, 4, 17], strides = [1, 1, 1]} : vector<14x4x22xbf16> to vector<1x4x17xbf16>
    %22 = vector.shape_cast %21 : vector<1x4x17xbf16> to vector<4x17xbf16>
    %23 = tpu.concatenate %18, %20, %22 in 0 : vector<4x17xbf16>, vector<4x17xbf16>, vector<4x17xbf16> -> vector<12x17xbf16>
    %24 = tpu.concatenate %16, %23 in 1 : vector<12x17xbf16>, vector<12x17xbf16> -> vector<12x34xbf16>
    %cst = arith.constant dense<0.000000e+00> : vector<2x34xf32>
    %25 = tpu.matmul %5, %24, %cst {dimension_numbers = #tpu.dot_dimension_numbers<[1], [0], [0], [1], [0, 0, 1, 1], [], []>} : vector<2x12xbf16>, vector<12x34xbf16>, vector<2x34xf32> -> vector<2x34xf32>
    %26 = vector.extract_strided_slice %4 {offsets = [0, 0, 3], sizes = [1, 4, 17], strides = [1, 1, 1]} : vector<14x4x22xbf16> to vector<1x4x17xbf16>
    %27 = vector.shape_cast %26 : vector<1x4x17xbf16> to vector<4x17xbf16>
    %28 = vector.extract_strided_slice %4 {offsets = [1, 0, 3], sizes = [1, 4, 17], strides = [1, 1, 1]} : vector<14x4x22xbf16> to vector<1x4x17xbf16>
    %29 = vector.shape_cast %28 : vector<1x4x17xbf16> to vector<4x17xbf16>
    %30 = vector.extract_strided_slice %4 {offsets = [2, 0, 3], sizes = [1, 4, 17], strides = [1, 1, 1]} : vector<14x4x22xbf16> to vector<1x4x17xbf16>
    %31 = vector.shape_cast %30 : vector<1x4x17xbf16> to vector<4x17xbf16>
    %32 = tpu.concatenate %27, %29, %31 in 0 : vector<4x17xbf16>, vector<4x17xbf16>, vector<4x17xbf16> -> vector<12x17xbf16>
    %33 = vector.extract_strided_slice %4 {offsets = [3, 0, 2], sizes = [1, 4, 17], strides = [1, 1, 1]} : vector<14x4x22xbf16> to vector<1x4x17xbf16>
    %34 = vector.shape_cast %33 : vector<1x4x17xbf16> to vector<4x17xbf16>
    %35 = vector.extract_strided_slice %4 {offsets = [4, 0, 2], sizes = [1, 4, 17], strides = [1, 1, 1]} : vector<14x4x22xbf16> to vector<1x4x17xbf16>
    %36 = vector.shape_cast %35 : vector<1x4x17xbf16> to vector<4x17xbf16>
    %37 = vector.extract_strided_slice %4 {offsets = [5, 0, 2], sizes = [1, 4, 17], strides = [1, 1, 1]} : vector<14x4x22xbf16> to vector<1x4x17xbf16>
    %38 = vector.shape_cast %37 : vector<1x4x17xbf16> to vector<4x17xbf16>
    %39 = tpu.concatenate %34, %36, %38 in 0 : vector<4x17xbf16>, vector<4x17xbf16>, vector<4x17xbf16> -> vector<12x17xbf16>
    %40 = tpu.concatenate %32, %39 in 1 : vector<12x17xbf16>, vector<12x17xbf16> -> vector<12x34xbf16>
    %cst_17 = arith.constant dense<0.000000e+00> : vector<2x34xf32>
    %41 = tpu.matmul %6, %40, %cst_17 {dimension_numbers = #tpu.dot_dimension_numbers<[1], [0], [0], [1], [0, 0, 1, 1], [], []>} : vector<2x12xbf16>, vector<12x34xbf16>, vector<2x34xf32> -> vector<2x34xf32>
    %42 = vector.extract_strided_slice %25 {offsets = [0, 0], sizes = [2, 17], strides = [1, 1]} : vector<2x34xf32> to vector<2x17xf32>
    %43 = vector.extract_strided_slice %25 {offsets = [0, 17], sizes = [2, 17], strides = [1, 1]} : vector<2x34xf32> to vector<2x17xf32>
    %44 = vector.extract_strided_slice %41 {offsets = [0, 0], sizes = [2, 17], strides = [1, 1]} : vector<2x34xf32> to vector<2x17xf32>
    %45 = vector.extract_strided_slice %41 {offsets = [0, 17], sizes = [2, 17], strides = [1, 1]} : vector<2x34xf32> to vector<2x17xf32>
    %46 = tpu.concatenate %42, %43, %44, %45 in 0 : vector<2x17xf32>, vector<2x17xf32>, vector<2x17xf32>, vector<2x17xf32> -> vector<8x17xf32>
    %47 = vector.broadcast %8 : vector<8x1xf32> to vector<8x17xf32>
    %48 = arith.addf %46, %47 : vector<8x17xf32>
    %cst_18 = arith.constant 0.000000e+00 : f32
    %49 = vector.broadcast %cst_18 : f32 to vector<8x17xf32>
    %50 = arith.cmpf oge, %48, %49 : vector<8x17xf32>
    %cst_19 = arith.constant 0.00999999977 : f32
    %51 = vector.broadcast %cst_19 : f32 to vector<8x17xf32>
    %52 = arith.mulf %51, %48 : vector<8x17xf32>
    %53 = arith.select %50, %48, %52 : vector<8x17xi1>, vector<8x17xf32>
    %54 = vector.extract_strided_slice %4 {offsets = [3, 0, 0], sizes = [1, 4, 17], strides = [1, 1, 1]} : vector<14x4x22xbf16> to vector<1x4x17xbf16>
    %55 = vector.shape_cast %54 : vector<1x4x17xbf16> to vector<4x17xbf16>
    %56 = vector.extract_strided_slice %4 {offsets = [3, 0, 1], sizes = [1, 4, 17], strides = [1, 1, 1]} : vector<14x4x22xbf16> to vector<1x4x17xbf16>
    %57 = vector.shape_cast %56 : vector<1x4x17xbf16> to vector<4x17xbf16>
    %58 = vector.extract_strided_slice %4 {offsets = [3, 0, 2], sizes = [1, 4, 17], strides = [1, 1, 1]} : vector<14x4x22xbf16> to vector<1x4x17xbf16>
    %59 = vector.shape_cast %58 : vector<1x4x17xbf16> to vector<4x17xbf16>
    %60 = tpu.concatenate %55, %57, %59 in 0 : vector<4x17xbf16>, vector<4x17xbf16>, vector<4x17xbf16> -> vector<12x17xbf16>
    %61 = vector.extract_strided_slice %4 {offsets = [4, 0, 3], sizes = [1, 4, 17], strides = [1, 1, 1]} : vector<14x4x22xbf16> to vector<1x4x17xbf16>
    %62 = vector.shape_cast %61 : vector<1x4x17xbf16> to vector<4x17xbf16>
    %63 = vector.extract_strided_slice %4 {offsets = [4, 0, 4], sizes = [1, 4, 17], strides = [1, 1, 1]} : vector<14x4x22xbf16> to vector<1x4x17xbf16>
    %64 = vector.shape_cast %63 : vector<1x4x17xbf16> to vector<4x17xbf16>
    %65 = vector.extract_strided_slice %4 {offsets = [4, 0, 5], sizes = [1, 4, 17], strides = [1, 1, 1]} : vector<14x4x22xbf16> to vector<1x4x17xbf16>
    %66 = vector.shape_cast %65 : vector<1x4x17xbf16> to vector<4x17xbf16>
    %67 = tpu.concatenate %62, %64, %66 in 0 : vector<4x17xbf16>, vector<4x17xbf16>, vector<4x17xbf16> -> vector<12x17xbf16>
    %68 = tpu.concatenate %60, %67 in 1 : vector<12x17xbf16>, vector<12x17xbf16> -> vector<12x34xbf16>
    %cst_20 = arith.constant dense<0.000000e+00> : vector<2x34xf32>
    %69 = tpu.matmul %5, %68, %cst_20 {dimension_numbers = #tpu.dot_dimension_numbers<[1], [0], [0], [1], [0, 0, 1, 1], [], []>} : vector<2x12xbf16>, vector<12x34xbf16>, vector<2x34xf32> -> vector<2x34xf32>
    %70 = vector.extract_strided_slice %4 {offsets = [1, 0, 3], sizes = [1, 4, 17], strides = [1, 1, 1]} : vector<14x4x22xbf16> to vector<1x4x17xbf16>
    %71 = vector.shape_cast %70 : vector<1x4x17xbf16> to vector<4x17xbf16>
    %72 = vector.extract_strided_slice %4 {offsets = [2, 0, 3], sizes = [1, 4, 17], strides = [1, 1, 1]} : vector<14x4x22xbf16> to vector<1x4x17xbf16>
    %73 = vector.shape_cast %72 : vector<1x4x17xbf16> to vector<4x17xbf16>
    %74 = vector.extract_strided_slice %4 {offsets = [3, 0, 3], sizes = [1, 4, 17], strides = [1, 1, 1]} : vector<14x4x22xbf16> to vector<1x4x17xbf16>
    %75 = vector.shape_cast %74 : vector<1x4x17xbf16> to vector<4x17xbf16>
    %76 = tpu.concatenate %71, %73, %75 in 0 : vector<4x17xbf16>, vector<4x17xbf16>, vector<4x17xbf16> -> vector<12x17xbf16>
    %77 = vector.extract_strided_slice %4 {offsets = [4, 0, 2], sizes = [1, 4, 17], strides = [1, 1, 1]} : vector<14x4x22xbf16> to vector<1x4x17xbf16>
    %78 = vector.shape_cast %77 : vector<1x4x17xbf16> to vector<4x17xbf16>
    %79 = vector.extract_strided_slice %4 {offsets = [5, 0, 2], sizes = [1, 4, 17], strides = [1, 1, 1]} : vector<14x4x22xbf16> to vector<1x4x17xbf16>
    %80 = vector.shape_cast %79 : vector<1x4x17xbf16> to vector<4x17xbf16>
    %81 = vector.extract_strided_slice %4 {offsets = [6, 0, 2], sizes = [1, 4, 17], strides = [1, 1, 1]} : vector<14x4x22xbf16> to vector<1x4x17xbf16>
    %82 = vector.shape_cast %81 : vector<1x4x17xbf16> to vector<4x17xbf16>
    %83 = tpu.concatenate %78, %80, %82 in 0 : vector<4x17xbf16>, vector<4x17xbf16>, vector<4x17xbf16> -> vector<12x17xbf16>
    %84 = tpu.concatenate %76, %83 in 1 : vector<12x17xbf16>, vector<12x17xbf16> -> vector<12x34xbf16>
    %cst_21 = arith.constant dense<0.000000e+00> : vector<2x34xf32>
    %85 = tpu.matmul %6, %84, %cst_21 {dimension_numbers = #tpu.dot_dimension_numbers<[1], [0], [0], [1], [0, 0, 1, 1], [], []>} : vector<2x12xbf16>, vector<12x34xbf16>, vector<2x34xf32> -> vector<2x34xf32>
    %86 = vector.extract_strided_slice %69 {offsets = [0, 0], sizes = [2, 17], strides = [1, 1]} : vector<2x34xf32> to vector<2x17xf32>
    %87 = vector.extract_strided_slice %69 {offsets = [0, 17], sizes = [2, 17], strides = [1, 1]} : vector<2x34xf32> to vector<2x17xf32>
    %88 = vector.extract_strided_slice %85 {offsets = [0, 0], sizes = [2, 17], strides = [1, 1]} : vector<2x34xf32> to vector<2x17xf32>
    %89 = vector.extract_strided_slice %85 {offsets = [0, 17], sizes = [2, 17], strides = [1, 1]} : vector<2x34xf32> to vector<2x17xf32>
    %90 = tpu.concatenate %86, %87, %88, %89 in 0 : vector<2x17xf32>, vector<2x17xf32>, vector<2x17xf32>, vector<2x17xf32> -> vector<8x17xf32>
    %91 = vector.broadcast %8 : vector<8x1xf32> to vector<8x17xf32>
    %92 = arith.addf %90, %91 : vector<8x17xf32>
    %cst_22 = arith.constant 0.000000e+00 : f32
    %93 = vector.broadcast %cst_22 : f32 to vector<8x17xf32>
    %94 = arith.cmpf oge, %92, %93 : vector<8x17xf32>
    %cst_23 = arith.constant 0.00999999977 : f32
    %95 = vector.broadcast %cst_23 : f32 to vector<8x17xf32>
    %96 = arith.mulf %95, %92 : vector<8x17xf32>
    %97 = arith.select %94, %92, %96 : vector<8x17xi1>, vector<8x17xf32>
    %98 = vector.extract_strided_slice %4 {offsets = [4, 0, 0], sizes = [1, 4, 17], strides = [1, 1, 1]} : vector<14x4x22xbf16> to vector<1x4x17xbf16>
    %99 = vector.shape_cast %98 : vector<1x4x17xbf16> to vector<4x17xbf16>
    %100 = vector.extract_strided_slice %4 {offsets = [4, 0, 1], sizes = [1, 4, 17], strides = [1, 1, 1]} : vector<14x4x22xbf16> to vector<1x4x17xbf16>
    %101 = vector.shape_cast %100 : vector<1x4x17xbf16> to vector<4x17xbf16>
    %102 = vector.extract_strided_slice %4 {offsets = [4, 0, 2], sizes = [1, 4, 17], strides = [1, 1, 1]} : vector<14x4x22xbf16> to vector<1x4x17xbf16>
    %103 = vector.shape_cast %102 : vector<1x4x17xbf16> to vector<4x17xbf16>
    %104 = tpu.concatenate %99, %101, %103 in 0 : vector<4x17xbf16>, vector<4x17xbf16>, vector<4x17xbf16> -> vector<12x17xbf16>
    %105 = vector.extract_strided_slice %4 {offsets = [5, 0, 3], sizes = [1, 4, 17], strides = [1, 1, 1]} : vector<14x4x22xbf16> to vector<1x4x17xbf16>
    %106 = vector.shape_cast %105 : vector<1x4x17xbf16> to vector<4x17xbf16>
    %107 = vector.extract_strided_slice %4 {offsets = [5, 0, 4], sizes = [1, 4, 17], strides = [1, 1, 1]} : vector<14x4x22xbf16> to vector<1x4x17xbf16>
    %108 = vector.shape_cast %107 : vector<1x4x17xbf16> to vector<4x17xbf16>
    %109 = vector.extract_strided_slice %4 {offsets = [5, 0, 5], sizes = [1, 4, 17], strides = [1, 1, 1]} : vector<14x4x22xbf16> to vector<1x4x17xbf16>
    %110 = vector.shape_cast %109 : vector<1x4x17xbf16> to vector<4x17xbf16>
    %111 = tpu.concatenate %106, %108, %110 in 0 : vector<4x17xbf16>, vector<4x17xbf16>, vector<4x17xbf16> -> vector<12x17xbf16>
    %112 = tpu.concatenate %104, %111 in 1 : vector<12x17xbf16>, vector<12x17xbf16> -> vector<12x34xbf16>
    %cst_24 = arith.constant dense<0.000000e+00> : vector<2x34xf32>
    %113 = tpu.matmul %5, %112, %cst_24 {dimension_numbers = #tpu.dot_dimension_numbers<[1], [0], [0], [1], [0, 0, 1, 1], [], []>} : vector<2x12xbf16>, vector<12x34xbf16>, vector<2x34xf32> -> vector<2x34xf32>
    %114 = vector.extract_strided_slice %4 {offsets = [2, 0, 3], sizes = [1, 4, 17], strides = [1, 1, 1]} : vector<14x4x22xbf16> to vector<1x4x17xbf16>
    %115 = vector.shape_cast %114 : vector<1x4x17xbf16> to vector<4x17xbf16>
    %116 = vector.extract_strided_slice %4 {offsets = [3, 0, 3], sizes = [1, 4, 17], strides = [1, 1, 1]} : vector<14x4x22xbf16> to vector<1x4x17xbf16>
    %117 = vector.shape_cast %116 : vector<1x4x17xbf16> to vector<4x17xbf16>
    %118 = vector.extract_strided_slice %4 {offsets = [4, 0, 3], sizes = [1, 4, 17], strides = [1, 1, 1]} : vector<14x4x22xbf16> to vector<1x4x17xbf16>
    %119 = vector.shape_cast %118 : vector<1x4x17xbf16> to vector<4x17xbf16>
    %120 = tpu.concatenate %115, %117, %119 in 0 : vector<4x17xbf16>, vector<4x17xbf16>, vector<4x17xbf16> -> vector<12x17xbf16>
    %121 = vector.extract_strided_slice %4 {offsets = [5, 0, 2], sizes = [1, 4, 17], strides = [1, 1, 1]} : vector<14x4x22xbf16> to vector<1x4x17xbf16>
    %122 = vector.shape_cast %121 : vector<1x4x17xbf16> to vector<4x17xbf16>
    %123 = vector.extract_strided_slice %4 {offsets = [6, 0, 2], sizes = [1, 4, 17], strides = [1, 1, 1]} : vector<14x4x22xbf16> to vector<1x4x17xbf16>
    %124 = vector.shape_cast %123 : vector<1x4x17xbf16> to vector<4x17xbf16>
    %125 = vector.extract_strided_slice %4 {offsets = [7, 0, 2], sizes = [1, 4, 17], strides = [1, 1, 1]} : vector<14x4x22xbf16> to vector<1x4x17xbf16>
    %126 = vector.shape_cast %125 : vector<1x4x17xbf16> to vector<4x17xbf16>
    %127 = tpu.concatenate %122, %124, %126 in 0 : vector<4x17xbf16>, vector<4x17xbf16>, vector<4x17xbf16> -> vector<12x17xbf16>
    %128 = tpu.concatenate %120, %127 in 1 : vector<12x17xbf16>, vector<12x17xbf16> -> vector<12x34xbf16>
    %cst_25 = arith.constant dense<0.000000e+00> : vector<2x34xf32>
    %129 = tpu.matmul %6, %128, %cst_25 {dimension_numbers = #tpu.dot_dimension_numbers<[1], [0], [0], [1], [0, 0, 1, 1], [], []>} : vector<2x12xbf16>, vector<12x34xbf16>, vector<2x34xf32> -> vector<2x34xf32>
    %130 = vector.extract_strided_slice %113 {offsets = [0, 0], sizes = [2, 17], strides = [1, 1]} : vector<2x34xf32> to vector<2x17xf32>
    %131 = vector.extract_strided_slice %113 {offsets = [0, 17], sizes = [2, 17], strides = [1, 1]} : vector<2x34xf32> to vector<2x17xf32>
    %132 = vector.extract_strided_slice %129 {offsets = [0, 0], sizes = [2, 17], strides = [1, 1]} : vector<2x34xf32> to vector<2x17xf32>
    %133 = vector.extract_strided_slice %129 {offsets = [0, 17], sizes = [2, 17], strides = [1, 1]} : vector<2x34xf32> to vector<2x17xf32>
    %134 = tpu.concatenate %130, %131, %132, %133 in 0 : vector<2x17xf32>, vector<2x17xf32>, vector<2x17xf32>, vector<2x17xf32> -> vector<8x17xf32>
    %135 = vector.broadcast %8 : vector<8x1xf32> to vector<8x17xf32>
    %136 = arith.addf %134, %135 : vector<8x17xf32>
    %cst_26 = arith.constant 0.000000e+00 : f32
    %137 = vector.broadcast %cst_26 : f32 to vector<8x17xf32>
    %138 = arith.cmpf oge, %136, %137 : vector<8x17xf32>
    %cst_27 = arith.constant 0.00999999977 : f32
    %139 = vector.broadcast %cst_27 : f32 to vector<8x17xf32>
    %140 = arith.mulf %139, %136 : vector<8x17xf32>
    %141 = arith.select %138, %136, %140 : vector<8x17xi1>, vector<8x17xf32>
    %142 = vector.extract_strided_slice %4 {offsets = [5, 0, 0], sizes = [1, 4, 17], strides = [1, 1, 1]} : vector<14x4x22xbf16> to vector<1x4x17xbf16>
    %143 = vector.shape_cast %142 : vector<1x4x17xbf16> to vector<4x17xbf16>
    %144 = vector.extract_strided_slice %4 {offsets = [5, 0, 1], sizes = [1, 4, 17], strides = [1, 1, 1]} : vector<14x4x22xbf16> to vector<1x4x17xbf16>
    %145 = vector.shape_cast %144 : vector<1x4x17xbf16> to vector<4x17xbf16>
    %146 = vector.extract_strided_slice %4 {offsets = [5, 0, 2], sizes = [1, 4, 17], strides = [1, 1, 1]} : vector<14x4x22xbf16> to vector<1x4x17xbf16>
    %147 = vector.shape_cast %146 : vector<1x4x17xbf16> to vector<4x17xbf16>
    %148 = tpu.concatenate %143, %145, %147 in 0 : vector<4x17xbf16>, vector<4x17xbf16>, vector<4x17xbf16> -> vector<12x17xbf16>
    %149 = vector.extract_strided_slice %4 {offsets = [6, 0, 3], sizes = [1, 4, 17], strides = [1, 1, 1]} : vector<14x4x22xbf16> to vector<1x4x17xbf16>
    %150 = vector.shape_cast %149 : vector<1x4x17xbf16> to vector<4x17xbf16>
    %151 = vector.extract_strided_slice %4 {offsets = [6, 0, 4], sizes = [1, 4, 17], strides = [1, 1, 1]} : vector<14x4x22xbf16> to vector<1x4x17xbf16>
    %152 = vector.shape_cast %151 : vector<1x4x17xbf16> to vector<4x17xbf16>
    %153 = vector.extract_strided_slice %4 {offsets = [6, 0, 5], sizes = [1, 4, 17], strides = [1, 1, 1]} : vector<14x4x22xbf16> to vector<1x4x17xbf16>
    %154 = vector.shape_cast %153 : vector<1x4x17xbf16> to vector<4x17xbf16>
    %155 = tpu.concatenate %150, %152, %154 in 0 : vector<4x17xbf16>, vector<4x17xbf16>, vector<4x17xbf16> -> vector<12x17xbf16>
    %156 = tpu.concatenate %148, %155 in 1 : vector<12x17xbf16>, vector<12x17xbf16> -> vector<12x34xbf16>
    %cst_28 = arith.constant dense<0.000000e+00> : vector<2x34xf32>
    %157 = tpu.matmul %5, %156, %cst_28 {dimension_numbers = #tpu.dot_dimension_numbers<[1], [0], [0], [1], [0, 0, 1, 1], [], []>} : vector<2x12xbf16>, vector<12x34xbf16>, vector<2x34xf32> -> vector<2x34xf32>
    %158 = vector.extract_strided_slice %4 {offsets = [3, 0, 3], sizes = [1, 4, 17], strides = [1, 1, 1]} : vector<14x4x22xbf16> to vector<1x4x17xbf16>
    %159 = vector.shape_cast %158 : vector<1x4x17xbf16> to vector<4x17xbf16>
    %160 = vector.extract_strided_slice %4 {offsets = [4, 0, 3], sizes = [1, 4, 17], strides = [1, 1, 1]} : vector<14x4x22xbf16> to vector<1x4x17xbf16>
    %161 = vector.shape_cast %160 : vector<1x4x17xbf16> to vector<4x17xbf16>
    %162 = vector.extract_strided_slice %4 {offsets = [5, 0, 3], sizes = [1, 4, 17], strides = [1, 1, 1]} : vector<14x4x22xbf16> to vector<1x4x17xbf16>
    %163 = vector.shape_cast %162 : vector<1x4x17xbf16> to vector<4x17xbf16>
    %164 = tpu.concatenate %159, %161, %163 in 0 : vector<4x17xbf16>, vector<4x17xbf16>, vector<4x17xbf16> -> vector<12x17xbf16>
    %165 = vector.extract_strided_slice %4 {offsets = [6, 0, 2], sizes = [1, 4, 17], strides = [1, 1, 1]} : vector<14x4x22xbf16> to vector<1x4x17xbf16>
    %166 = vector.shape_cast %165 : vector<1x4x17xbf16> to vector<4x17xbf16>
    %167 = vector.extract_strided_slice %4 {offsets = [7, 0, 2], sizes = [1, 4, 17], strides = [1, 1, 1]} : vector<14x4x22xbf16> to vector<1x4x17xbf16>
    %168 = vector.shape_cast %167 : vector<1x4x17xbf16> to vector<4x17xbf16>
    %169 = vector.extract_strided_slice %4 {offsets = [8, 0, 2], sizes = [1, 4, 17], strides = [1, 1, 1]} : vector<14x4x22xbf16> to vector<1x4x17xbf16>
    %170 = vector.shape_cast %169 : vector<1x4x17xbf16> to vector<4x17xbf16>
    %171 = tpu.concatenate %166, %168, %170 in 0 : vector<4x17xbf16>, vector<4x17xbf16>, vector<4x17xbf16> -> vector<12x17xbf16>
    %172 = tpu.concatenate %164, %171 in 1 : vector<12x17xbf16>, vector<12x17xbf16> -> vector<12x34xbf16>
    %cst_29 = arith.constant dense<0.000000e+00> : vector<2x34xf32>
    %173 = tpu.matmul %6, %172, %cst_29 {dimension_numbers = #tpu.dot_dimension_numbers<[1], [0], [0], [1], [0, 0, 1, 1], [], []>} : vector<2x12xbf16>, vector<12x34xbf16>, vector<2x34xf32> -> vector<2x34xf32>
    %174 = vector.extract_strided_slice %157 {offsets = [0, 0], sizes = [2, 17], strides = [1, 1]} : vector<2x34xf32> to vector<2x17xf32>
    %175 = vector.extract_strided_slice %157 {offsets = [0, 17], sizes = [2, 17], strides = [1, 1]} : vector<2x34xf32> to vector<2x17xf32>
    %176 = vector.extract_strided_slice %173 {offsets = [0, 0], sizes = [2, 17], strides = [1, 1]} : vector<2x34xf32> to vector<2x17xf32>
    %177 = vector.extract_strided_slice %173 {offsets = [0, 17], sizes = [2, 17], strides = [1, 1]} : vector<2x34xf32> to vector<2x17xf32>
    %178 = tpu.concatenate %174, %175, %176, %177 in 0 : vector<2x17xf32>, vector<2x17xf32>, vector<2x17xf32>, vector<2x17xf32> -> vector<8x17xf32>
    %179 = vector.broadcast %8 : vector<8x1xf32> to vector<8x17xf32>
    %180 = arith.addf %178, %179 : vector<8x17xf32>
    %cst_30 = arith.constant 0.000000e+00 : f32
    %181 = vector.broadcast %cst_30 : f32 to vector<8x17xf32>
    %182 = arith.cmpf oge, %180, %181 : vector<8x17xf32>
    %cst_31 = arith.constant 0.00999999977 : f32
    %183 = vector.broadcast %cst_31 : f32 to vector<8x17xf32>
    %184 = arith.mulf %183, %180 : vector<8x17xf32>
    %185 = arith.select %182, %180, %184 : vector<8x17xi1>, vector<8x17xf32>
    %186 = vector.extract_strided_slice %4 {offsets = [6, 0, 0], sizes = [1, 4, 17], strides = [1, 1, 1]} : vector<14x4x22xbf16> to vector<1x4x17xbf16>
    %187 = vector.shape_cast %186 : vector<1x4x17xbf16> to vector<4x17xbf16>
    %188 = vector.extract_strided_slice %4 {offsets = [6, 0, 1], sizes = [1, 4, 17], strides = [1, 1, 1]} : vector<14x4x22xbf16> to vector<1x4x17xbf16>
    %189 = vector.shape_cast %188 : vector<1x4x17xbf16> to vector<4x17xbf16>
    %190 = vector.extract_strided_slice %4 {offsets = [6, 0, 2], sizes = [1, 4, 17], strides = [1, 1, 1]} : vector<14x4x22xbf16> to vector<1x4x17xbf16>
    %191 = vector.shape_cast %190 : vector<1x4x17xbf16> to vector<4x17xbf16>
    %192 = tpu.concatenate %187, %189, %191 in 0 : vector<4x17xbf16>, vector<4x17xbf16>, vector<4x17xbf16> -> vector<12x17xbf16>
    %193 = vector.extract_strided_slice %4 {offsets = [7, 0, 3], sizes = [1, 4, 17], strides = [1, 1, 1]} : vector<14x4x22xbf16> to vector<1x4x17xbf16>
    %194 = vector.shape_cast %193 : vector<1x4x17xbf16> to vector<4x17xbf16>
    %195 = vector.extract_strided_slice %4 {offsets = [7, 0, 4], sizes = [1, 4, 17], strides = [1, 1, 1]} : vector<14x4x22xbf16> to vector<1x4x17xbf16>
    %196 = vector.shape_cast %195 : vector<1x4x17xbf16> to vector<4x17xbf16>
    %197 = vector.extract_strided_slice %4 {offsets = [7, 0, 5], sizes = [1, 4, 17], strides = [1, 1, 1]} : vector<14x4x22xbf16> to vector<1x4x17xbf16>
    %198 = vector.shape_cast %197 : vector<1x4x17xbf16> to vector<4x17xbf16>
    %199 = tpu.concatenate %194, %196, %198 in 0 : vector<4x17xbf16>, vector<4x17xbf16>, vector<4x17xbf16> -> vector<12x17xbf16>
    %200 = tpu.concatenate %192, %199 in 1 : vector<12x17xbf16>, vector<12x17xbf16> -> vector<12x34xbf16>
    %cst_32 = arith.constant dense<0.000000e+00> : vector<2x34xf32>
    %201 = tpu.matmul %5, %200, %cst_32 {dimension_numbers = #tpu.dot_dimension_numbers<[1], [0], [0], [1], [0, 0, 1, 1], [], []>} : vector<2x12xbf16>, vector<12x34xbf16>, vector<2x34xf32> -> vector<2x34xf32>
    %202 = vector.extract_strided_slice %4 {offsets = [4, 0, 3], sizes = [1, 4, 17], strides = [1, 1, 1]} : vector<14x4x22xbf16> to vector<1x4x17xbf16>
    %203 = vector.shape_cast %202 : vector<1x4x17xbf16> to vector<4x17xbf16>
    %204 = vector.extract_strided_slice %4 {offsets = [5, 0, 3], sizes = [1, 4, 17], strides = [1, 1, 1]} : vector<14x4x22xbf16> to vector<1x4x17xbf16>
    %205 = vector.shape_cast %204 : vector<1x4x17xbf16> to vector<4x17xbf16>
    %206 = vector.extract_strided_slice %4 {offsets = [6, 0, 3], sizes = [1, 4, 17], strides = [1, 1, 1]} : vector<14x4x22xbf16> to vector<1x4x17xbf16>
    %207 = vector.shape_cast %206 : vector<1x4x17xbf16> to vector<4x17xbf16>
    %208 = tpu.concatenate %203, %205, %207 in 0 : vector<4x17xbf16>, vector<4x17xbf16>, vector<4x17xbf16> -> vector<12x17xbf16>
    %209 = vector.extract_strided_slice %4 {offsets = [7, 0, 2], sizes = [1, 4, 17], strides = [1, 1, 1]} : vector<14x4x22xbf16> to vector<1x4x17xbf16>
    %210 = vector.shape_cast %209 : vector<1x4x17xbf16> to vector<4x17xbf16>
    %211 = vector.extract_strided_slice %4 {offsets = [8, 0, 2], sizes = [1, 4, 17], strides = [1, 1, 1]} : vector<14x4x22xbf16> to vector<1x4x17xbf16>
    %212 = vector.shape_cast %211 : vector<1x4x17xbf16> to vector<4x17xbf16>
    %213 = vector.extract_strided_slice %4 {offsets = [9, 0, 2], sizes = [1, 4, 17], strides = [1, 1, 1]} : vector<14x4x22xbf16> to vector<1x4x17xbf16>
    %214 = vector.shape_cast %213 : vector<1x4x17xbf16> to vector<4x17xbf16>
    %215 = tpu.concatenate %210, %212, %214 in 0 : vector<4x17xbf16>, vector<4x17xbf16>, vector<4x17xbf16> -> vector<12x17xbf16>
    %216 = tpu.concatenate %208, %215 in 1 : vector<12x17xbf16>, vector<12x17xbf16> -> vector<12x34xbf16>
    %cst_33 = arith.constant dense<0.000000e+00> : vector<2x34xf32>
    %217 = tpu.matmul %6, %216, %cst_33 {dimension_numbers = #tpu.dot_dimension_numbers<[1], [0], [0], [1], [0, 0, 1, 1], [], []>} : vector<2x12xbf16>, vector<12x34xbf16>, vector<2x34xf32> -> vector<2x34xf32>
    %218 = vector.extract_strided_slice %201 {offsets = [0, 0], sizes = [2, 17], strides = [1, 1]} : vector<2x34xf32> to vector<2x17xf32>
    %219 = vector.extract_strided_slice %201 {offsets = [0, 17], sizes = [2, 17], strides = [1, 1]} : vector<2x34xf32> to vector<2x17xf32>
    %220 = vector.extract_strided_slice %217 {offsets = [0, 0], sizes = [2, 17], strides = [1, 1]} : vector<2x34xf32> to vector<2x17xf32>
    %221 = vector.extract_strided_slice %217 {offsets = [0, 17], sizes = [2, 17], strides = [1, 1]} : vector<2x34xf32> to vector<2x17xf32>
    %222 = tpu.concatenate %218, %219, %220, %221 in 0 : vector<2x17xf32>, vector<2x17xf32>, vector<2x17xf32>, vector<2x17xf32> -> vector<8x17xf32>
    %223 = vector.broadcast %8 : vector<8x1xf32> to vector<8x17xf32>
    %224 = arith.addf %222, %223 : vector<8x17xf32>
    %cst_34 = arith.constant 0.000000e+00 : f32
    %225 = vector.broadcast %cst_34 : f32 to vector<8x17xf32>
    %226 = arith.cmpf oge, %224, %225 : vector<8x17xf32>
    %cst_35 = arith.constant 0.00999999977 : f32
    %227 = vector.broadcast %cst_35 : f32 to vector<8x17xf32>
    %228 = arith.mulf %227, %224 : vector<8x17xf32>
    %229 = arith.select %226, %224, %228 : vector<8x17xi1>, vector<8x17xf32>
    %230 = vector.extract_strided_slice %4 {offsets = [7, 0, 0], sizes = [1, 4, 17], strides = [1, 1, 1]} : vector<14x4x22xbf16> to vector<1x4x17xbf16>
    %231 = vector.shape_cast %230 : vector<1x4x17xbf16> to vector<4x17xbf16>
    %232 = vector.extract_strided_slice %4 {offsets = [7, 0, 1], sizes = [1, 4, 17], strides = [1, 1, 1]} : vector<14x4x22xbf16> to vector<1x4x17xbf16>
    %233 = vector.shape_cast %232 : vector<1x4x17xbf16> to vector<4x17xbf16>
    %234 = vector.extract_strided_slice %4 {offsets = [7, 0, 2], sizes = [1, 4, 17], strides = [1, 1, 1]} : vector<14x4x22xbf16> to vector<1x4x17xbf16>
    %235 = vector.shape_cast %234 : vector<1x4x17xbf16> to vector<4x17xbf16>
    %236 = tpu.concatenate %231, %233, %235 in 0 : vector<4x17xbf16>, vector<4x17xbf16>, vector<4x17xbf16> -> vector<12x17xbf16>
    %237 = vector.extract_strided_slice %4 {offsets = [8, 0, 3], sizes = [1, 4, 17], strides = [1, 1, 1]} : vector<14x4x22xbf16> to vector<1x4x17xbf16>
    %238 = vector.shape_cast %237 : vector<1x4x17xbf16> to vector<4x17xbf16>
    %239 = vector.extract_strided_slice %4 {offsets = [8, 0, 4], sizes = [1, 4, 17], strides = [1, 1, 1]} : vector<14x4x22xbf16> to vector<1x4x17xbf16>
    %240 = vector.shape_cast %239 : vector<1x4x17xbf16> to vector<4x17xbf16>
    %241 = vector.extract_strided_slice %4 {offsets = [8, 0, 5], sizes = [1, 4, 17], strides = [1, 1, 1]} : vector<14x4x22xbf16> to vector<1x4x17xbf16>
    %242 = vector.shape_cast %241 : vector<1x4x17xbf16> to vector<4x17xbf16>
    %243 = tpu.concatenate %238, %240, %242 in 0 : vector<4x17xbf16>, vector<4x17xbf16>, vector<4x17xbf16> -> vector<12x17xbf16>
    %244 = tpu.concatenate %236, %243 in 1 : vector<12x17xbf16>, vector<12x17xbf16> -> vector<12x34xbf16>
    %cst_36 = arith.constant dense<0.000000e+00> : vector<2x34xf32>
    %245 = tpu.matmul %5, %244, %cst_36 {dimension_numbers = #tpu.dot_dimension_numbers<[1], [0], [0], [1], [0, 0, 1, 1], [], []>} : vector<2x12xbf16>, vector<12x34xbf16>, vector<2x34xf32> -> vector<2x34xf32>
    %246 = vector.extract_strided_slice %4 {offsets = [5, 0, 3], sizes = [1, 4, 17], strides = [1, 1, 1]} : vector<14x4x22xbf16> to vector<1x4x17xbf16>
    %247 = vector.shape_cast %246 : vector<1x4x17xbf16> to vector<4x17xbf16>
    %248 = vector.extract_strided_slice %4 {offsets = [6, 0, 3], sizes = [1, 4, 17], strides = [1, 1, 1]} : vector<14x4x22xbf16> to vector<1x4x17xbf16>
    %249 = vector.shape_cast %248 : vector<1x4x17xbf16> to vector<4x17xbf16>
    %250 = vector.extract_strided_slice %4 {offsets = [7, 0, 3], sizes = [1, 4, 17], strides = [1, 1, 1]} : vector<14x4x22xbf16> to vector<1x4x17xbf16>
    %251 = vector.shape_cast %250 : vector<1x4x17xbf16> to vector<4x17xbf16>
    %252 = tpu.concatenate %247, %249, %251 in 0 : vector<4x17xbf16>, vector<4x17xbf16>, vector<4x17xbf16> -> vector<12x17xbf16>
    %253 = vector.extract_strided_slice %4 {offsets = [8, 0, 2], sizes = [1, 4, 17], strides = [1, 1, 1]} : vector<14x4x22xbf16> to vector<1x4x17xbf16>
    %254 = vector.shape_cast %253 : vector<1x4x17xbf16> to vector<4x17xbf16>
    %255 = vector.extract_strided_slice %4 {offsets = [9, 0, 2], sizes = [1, 4, 17], strides = [1, 1, 1]} : vector<14x4x22xbf16> to vector<1x4x17xbf16>
    %256 = vector.shape_cast %255 : vector<1x4x17xbf16> to vector<4x17xbf16>
    %257 = vector.extract_strided_slice %4 {offsets = [10, 0, 2], sizes = [1, 4, 17], strides = [1, 1, 1]} : vector<14x4x22xbf16> to vector<1x4x17xbf16>
    %258 = vector.shape_cast %257 : vector<1x4x17xbf16> to vector<4x17xbf16>
    %259 = tpu.concatenate %254, %256, %258 in 0 : vector<4x17xbf16>, vector<4x17xbf16>, vector<4x17xbf16> -> vector<12x17xbf16>
    %260 = tpu.concatenate %252, %259 in 1 : vector<12x17xbf16>, vector<12x17xbf16> -> vector<12x34xbf16>
    %cst_37 = arith.constant dense<0.000000e+00> : vector<2x34xf32>
    %261 = tpu.matmul %6, %260, %cst_37 {dimension_numbers = #tpu.dot_dimension_numbers<[1], [0], [0], [1], [0, 0, 1, 1], [], []>} : vector<2x12xbf16>, vector<12x34xbf16>, vector<2x34xf32> -> vector<2x34xf32>
    %262 = vector.extract_strided_slice %245 {offsets = [0, 0], sizes = [2, 17], strides = [1, 1]} : vector<2x34xf32> to vector<2x17xf32>
    %263 = vector.extract_strided_slice %245 {offsets = [0, 17], sizes = [2, 17], strides = [1, 1]} : vector<2x34xf32> to vector<2x17xf32>
    %264 = vector.extract_strided_slice %261 {offsets = [0, 0], sizes = [2, 17], strides = [1, 1]} : vector<2x34xf32> to vector<2x17xf32>
    %265 = vector.extract_strided_slice %261 {offsets = [0, 17], sizes = [2, 17], strides = [1, 1]} : vector<2x34xf32> to vector<2x17xf32>
    %266 = tpu.concatenate %262, %263, %264, %265 in 0 : vector<2x17xf32>, vector<2x17xf32>, vector<2x17xf32>, vector<2x17xf32> -> vector<8x17xf32>
    %267 = vector.broadcast %8 : vector<8x1xf32> to vector<8x17xf32>
    %268 = arith.addf %266, %267 : vector<8x17xf32>
    %cst_38 = arith.constant 0.000000e+00 : f32
    %269 = vector.broadcast %cst_38 : f32 to vector<8x17xf32>
    %270 = arith.cmpf oge, %268, %269 : vector<8x17xf32>
    %cst_39 = arith.constant 0.00999999977 : f32
    %271 = vector.broadcast %cst_39 : f32 to vector<8x17xf32>
    %272 = arith.mulf %271, %268 : vector<8x17xf32>
    %273 = arith.select %270, %268, %272 : vector<8x17xi1>, vector<8x17xf32>
    %274 = vector.extract_strided_slice %4 {offsets = [8, 0, 0], sizes = [1, 4, 17], strides = [1, 1, 1]} : vector<14x4x22xbf16> to vector<1x4x17xbf16>
    %275 = vector.shape_cast %274 : vector<1x4x17xbf16> to vector<4x17xbf16>
    %276 = vector.extract_strided_slice %4 {offsets = [8, 0, 1], sizes = [1, 4, 17], strides = [1, 1, 1]} : vector<14x4x22xbf16> to vector<1x4x17xbf16>
    %277 = vector.shape_cast %276 : vector<1x4x17xbf16> to vector<4x17xbf16>
    %278 = vector.extract_strided_slice %4 {offsets = [8, 0, 2], sizes = [1, 4, 17], strides = [1, 1, 1]} : vector<14x4x22xbf16> to vector<1x4x17xbf16>
    %279 = vector.shape_cast %278 : vector<1x4x17xbf16> to vector<4x17xbf16>
    %280 = tpu.concatenate %275, %277, %279 in 0 : vector<4x17xbf16>, vector<4x17xbf16>, vector<4x17xbf16> -> vector<12x17xbf16>
    %281 = vector.extract_strided_slice %4 {offsets = [9, 0, 3], sizes = [1, 4, 17], strides = [1, 1, 1]} : vector<14x4x22xbf16> to vector<1x4x17xbf16>
    %282 = vector.shape_cast %281 : vector<1x4x17xbf16> to vector<4x17xbf16>
    %283 = vector.extract_strided_slice %4 {offsets = [9, 0, 4], sizes = [1, 4, 17], strides = [1, 1, 1]} : vector<14x4x22xbf16> to vector<1x4x17xbf16>
    %284 = vector.shape_cast %283 : vector<1x4x17xbf16> to vector<4x17xbf16>
    %285 = vector.extract_strided_slice %4 {offsets = [9, 0, 5], sizes = [1, 4, 17], strides = [1, 1, 1]} : vector<14x4x22xbf16> to vector<1x4x17xbf16>
    %286 = vector.shape_cast %285 : vector<1x4x17xbf16> to vector<4x17xbf16>
    %287 = tpu.concatenate %282, %284, %286 in 0 : vector<4x17xbf16>, vector<4x17xbf16>, vector<4x17xbf16> -> vector<12x17xbf16>
    %288 = tpu.concatenate %280, %287 in 1 : vector<12x17xbf16>, vector<12x17xbf16> -> vector<12x34xbf16>
    %cst_40 = arith.constant dense<0.000000e+00> : vector<2x34xf32>
    %289 = tpu.matmul %5, %288, %cst_40 {dimension_numbers = #tpu.dot_dimension_numbers<[1], [0], [0], [1], [0, 0, 1, 1], [], []>} : vector<2x12xbf16>, vector<12x34xbf16>, vector<2x34xf32> -> vector<2x34xf32>
    %290 = vector.extract_strided_slice %4 {offsets = [6, 0, 3], sizes = [1, 4, 17], strides = [1, 1, 1]} : vector<14x4x22xbf16> to vector<1x4x17xbf16>
    %291 = vector.shape_cast %290 : vector<1x4x17xbf16> to vector<4x17xbf16>
    %292 = vector.extract_strided_slice %4 {offsets = [7, 0, 3], sizes = [1, 4, 17], strides = [1, 1, 1]} : vector<14x4x22xbf16> to vector<1x4x17xbf16>
    %293 = vector.shape_cast %292 : vector<1x4x17xbf16> to vector<4x17xbf16>
    %294 = vector.extract_strided_slice %4 {offsets = [8, 0, 3], sizes = [1, 4, 17], strides = [1, 1, 1]} : vector<14x4x22xbf16> to vector<1x4x17xbf16>
    %295 = vector.shape_cast %294 : vector<1x4x17xbf16> to vector<4x17xbf16>
    %296 = tpu.concatenate %291, %293, %295 in 0 : vector<4x17xbf16>, vector<4x17xbf16>, vector<4x17xbf16> -> vector<12x17xbf16>
    %297 = vector.extract_strided_slice %4 {offsets = [9, 0, 2], sizes = [1, 4, 17], strides = [1, 1, 1]} : vector<14x4x22xbf16> to vector<1x4x17xbf16>
    %298 = vector.shape_cast %297 : vector<1x4x17xbf16> to vector<4x17xbf16>
    %299 = vector.extract_strided_slice %4 {offsets = [10, 0, 2], sizes = [1, 4, 17], strides = [1, 1, 1]} : vector<14x4x22xbf16> to vector<1x4x17xbf16>
    %300 = vector.shape_cast %299 : vector<1x4x17xbf16> to vector<4x17xbf16>
    %301 = vector.extract_strided_slice %4 {offsets = [11, 0, 2], sizes = [1, 4, 17], strides = [1, 1, 1]} : vector<14x4x22xbf16> to vector<1x4x17xbf16>
    %302 = vector.shape_cast %301 : vector<1x4x17xbf16> to vector<4x17xbf16>
    %303 = tpu.concatenate %298, %300, %302 in 0 : vector<4x17xbf16>, vector<4x17xbf16>, vector<4x17xbf16> -> vector<12x17xbf16>
    %304 = tpu.concatenate %296, %303 in 1 : vector<12x17xbf16>, vector<12x17xbf16> -> vector<12x34xbf16>
    %cst_41 = arith.constant dense<0.000000e+00> : vector<2x34xf32>
    %305 = tpu.matmul %6, %304, %cst_41 {dimension_numbers = #tpu.dot_dimension_numbers<[1], [0], [0], [1], [0, 0, 1, 1], [], []>} : vector<2x12xbf16>, vector<12x34xbf16>, vector<2x34xf32> -> vector<2x34xf32>
    %306 = vector.extract_strided_slice %289 {offsets = [0, 0], sizes = [2, 17], strides = [1, 1]} : vector<2x34xf32> to vector<2x17xf32>
    %307 = vector.extract_strided_slice %289 {offsets = [0, 17], sizes = [2, 17], strides = [1, 1]} : vector<2x34xf32> to vector<2x17xf32>
    %308 = vector.extract_strided_slice %305 {offsets = [0, 0], sizes = [2, 17], strides = [1, 1]} : vector<2x34xf32> to vector<2x17xf32>
    %309 = vector.extract_strided_slice %305 {offsets = [0, 17], sizes = [2, 17], strides = [1, 1]} : vector<2x34xf32> to vector<2x17xf32>
    %310 = tpu.concatenate %306, %307, %308, %309 in 0 : vector<2x17xf32>, vector<2x17xf32>, vector<2x17xf32>, vector<2x17xf32> -> vector<8x17xf32>
    %311 = vector.broadcast %8 : vector<8x1xf32> to vector<8x17xf32>
    %312 = arith.addf %310, %311 : vector<8x17xf32>
    %cst_42 = arith.constant 0.000000e+00 : f32
    %313 = vector.broadcast %cst_42 : f32 to vector<8x17xf32>
    %314 = arith.cmpf oge, %312, %313 : vector<8x17xf32>
    %cst_43 = arith.constant 0.00999999977 : f32
    %315 = vector.broadcast %cst_43 : f32 to vector<8x17xf32>
    %316 = arith.mulf %315, %312 : vector<8x17xf32>
    %317 = arith.select %314, %312, %316 : vector<8x17xi1>, vector<8x17xf32>
    %318 = vector.extract_strided_slice %4 {offsets = [9, 0, 0], sizes = [1, 4, 17], strides = [1, 1, 1]} : vector<14x4x22xbf16> to vector<1x4x17xbf16>
    %319 = vector.shape_cast %318 : vector<1x4x17xbf16> to vector<4x17xbf16>
    %320 = vector.extract_strided_slice %4 {offsets = [9, 0, 1], sizes = [1, 4, 17], strides = [1, 1, 1]} : vector<14x4x22xbf16> to vector<1x4x17xbf16>
    %321 = vector.shape_cast %320 : vector<1x4x17xbf16> to vector<4x17xbf16>
    %322 = vector.extract_strided_slice %4 {offsets = [9, 0, 2], sizes = [1, 4, 17], strides = [1, 1, 1]} : vector<14x4x22xbf16> to vector<1x4x17xbf16>
    %323 = vector.shape_cast %322 : vector<1x4x17xbf16> to vector<4x17xbf16>
    %324 = tpu.concatenate %319, %321, %323 in 0 : vector<4x17xbf16>, vector<4x17xbf16>, vector<4x17xbf16> -> vector<12x17xbf16>
    %325 = vector.extract_strided_slice %4 {offsets = [10, 0, 3], sizes = [1, 4, 17], strides = [1, 1, 1]} : vector<14x4x22xbf16> to vector<1x4x17xbf16>
    %326 = vector.shape_cast %325 : vector<1x4x17xbf16> to vector<4x17xbf16>
    %327 = vector.extract_strided_slice %4 {offsets = [10, 0, 4], sizes = [1, 4, 17], strides = [1, 1, 1]} : vector<14x4x22xbf16> to vector<1x4x17xbf16>
    %328 = vector.shape_cast %327 : vector<1x4x17xbf16> to vector<4x17xbf16>
    %329 = vector.extract_strided_slice %4 {offsets = [10, 0, 5], sizes = [1, 4, 17], strides = [1, 1, 1]} : vector<14x4x22xbf16> to vector<1x4x17xbf16>
    %330 = vector.shape_cast %329 : vector<1x4x17xbf16> to vector<4x17xbf16>
    %331 = tpu.concatenate %326, %328, %330 in 0 : vector<4x17xbf16>, vector<4x17xbf16>, vector<4x17xbf16> -> vector<12x17xbf16>
    %332 = tpu.concatenate %324, %331 in 1 : vector<12x17xbf16>, vector<12x17xbf16> -> vector<12x34xbf16>
    %cst_44 = arith.constant dense<0.000000e+00> : vector<2x34xf32>
    %333 = tpu.matmul %5, %332, %cst_44 {dimension_numbers = #tpu.dot_dimension_numbers<[1], [0], [0], [1], [0, 0, 1, 1], [], []>} : vector<2x12xbf16>, vector<12x34xbf16>, vector<2x34xf32> -> vector<2x34xf32>
    %334 = vector.extract_strided_slice %4 {offsets = [7, 0, 3], sizes = [1, 4, 17], strides = [1, 1, 1]} : vector<14x4x22xbf16> to vector<1x4x17xbf16>
    %335 = vector.shape_cast %334 : vector<1x4x17xbf16> to vector<4x17xbf16>
    %336 = vector.extract_strided_slice %4 {offsets = [8, 0, 3], sizes = [1, 4, 17], strides = [1, 1, 1]} : vector<14x4x22xbf16> to vector<1x4x17xbf16>
    %337 = vector.shape_cast %336 : vector<1x4x17xbf16> to vector<4x17xbf16>
    %338 = vector.extract_strided_slice %4 {offsets = [9, 0, 3], sizes = [1, 4, 17], strides = [1, 1, 1]} : vector<14x4x22xbf16> to vector<1x4x17xbf16>
    %339 = vector.shape_cast %338 : vector<1x4x17xbf16> to vector<4x17xbf16>
    %340 = tpu.concatenate %335, %337, %339 in 0 : vector<4x17xbf16>, vector<4x17xbf16>, vector<4x17xbf16> -> vector<12x17xbf16>
    %341 = vector.extract_strided_slice %4 {offsets = [10, 0, 2], sizes = [1, 4, 17], strides = [1, 1, 1]} : vector<14x4x22xbf16> to vector<1x4x17xbf16>
    %342 = vector.shape_cast %341 : vector<1x4x17xbf16> to vector<4x17xbf16>
    %343 = vector.extract_strided_slice %4 {offsets = [11, 0, 2], sizes = [1, 4, 17], strides = [1, 1, 1]} : vector<14x4x22xbf16> to vector<1x4x17xbf16>
    %344 = vector.shape_cast %343 : vector<1x4x17xbf16> to vector<4x17xbf16>
    %345 = vector.extract_strided_slice %4 {offsets = [12, 0, 2], sizes = [1, 4, 17], strides = [1, 1, 1]} : vector<14x4x22xbf16> to vector<1x4x17xbf16>
    %346 = vector.shape_cast %345 : vector<1x4x17xbf16> to vector<4x17xbf16>
    %347 = tpu.concatenate %342, %344, %346 in 0 : vector<4x17xbf16>, vector<4x17xbf16>, vector<4x17xbf16> -> vector<12x17xbf16>
    %348 = tpu.concatenate %340, %347 in 1 : vector<12x17xbf16>, vector<12x17xbf16> -> vector<12x34xbf16>
    %cst_45 = arith.constant dense<0.000000e+00> : vector<2x34xf32>
    %349 = tpu.matmul %6, %348, %cst_45 {dimension_numbers = #tpu.dot_dimension_numbers<[1], [0], [0], [1], [0, 0, 1, 1], [], []>} : vector<2x12xbf16>, vector<12x34xbf16>, vector<2x34xf32> -> vector<2x34xf32>
    %350 = vector.extract_strided_slice %333 {offsets = [0, 0], sizes = [2, 17], strides = [1, 1]} : vector<2x34xf32> to vector<2x17xf32>
    %351 = vector.extract_strided_slice %333 {offsets = [0, 17], sizes = [2, 17], strides = [1, 1]} : vector<2x34xf32> to vector<2x17xf32>
    %352 = vector.extract_strided_slice %349 {offsets = [0, 0], sizes = [2, 17], strides = [1, 1]} : vector<2x34xf32> to vector<2x17xf32>
    %353 = vector.extract_strided_slice %349 {offsets = [0, 17], sizes = [2, 17], strides = [1, 1]} : vector<2x34xf32> to vector<2x17xf32>
    %354 = tpu.concatenate %350, %351, %352, %353 in 0 : vector<2x17xf32>, vector<2x17xf32>, vector<2x17xf32>, vector<2x17xf32> -> vector<8x17xf32>
    %355 = vector.broadcast %8 : vector<8x1xf32> to vector<8x17xf32>
    %356 = arith.addf %354, %355 : vector<8x17xf32>
    %cst_46 = arith.constant 0.000000e+00 : f32
    %357 = vector.broadcast %cst_46 : f32 to vector<8x17xf32>
    %358 = arith.cmpf oge, %356, %357 : vector<8x17xf32>
    %cst_47 = arith.constant 0.00999999977 : f32
    %359 = vector.broadcast %cst_47 : f32 to vector<8x17xf32>
    %360 = arith.mulf %359, %356 : vector<8x17xf32>
    %361 = arith.select %358, %356, %360 : vector<8x17xi1>, vector<8x17xf32>
    %362 = vector.extract_strided_slice %4 {offsets = [10, 0, 0], sizes = [1, 4, 17], strides = [1, 1, 1]} : vector<14x4x22xbf16> to vector<1x4x17xbf16>
    %363 = vector.shape_cast %362 : vector<1x4x17xbf16> to vector<4x17xbf16>
    %364 = vector.extract_strided_slice %4 {offsets = [10, 0, 1], sizes = [1, 4, 17], strides = [1, 1, 1]} : vector<14x4x22xbf16> to vector<1x4x17xbf16>
    %365 = vector.shape_cast %364 : vector<1x4x17xbf16> to vector<4x17xbf16>
    %366 = vector.extract_strided_slice %4 {offsets = [10, 0, 2], sizes = [1, 4, 17], strides = [1, 1, 1]} : vector<14x4x22xbf16> to vector<1x4x17xbf16>
    %367 = vector.shape_cast %366 : vector<1x4x17xbf16> to vector<4x17xbf16>
    %368 = tpu.concatenate %363, %365, %367 in 0 : vector<4x17xbf16>, vector<4x17xbf16>, vector<4x17xbf16> -> vector<12x17xbf16>
    %369 = vector.extract_strided_slice %4 {offsets = [11, 0, 3], sizes = [1, 4, 17], strides = [1, 1, 1]} : vector<14x4x22xbf16> to vector<1x4x17xbf16>
    %370 = vector.shape_cast %369 : vector<1x4x17xbf16> to vector<4x17xbf16>
    %371 = vector.extract_strided_slice %4 {offsets = [11, 0, 4], sizes = [1, 4, 17], strides = [1, 1, 1]} : vector<14x4x22xbf16> to vector<1x4x17xbf16>
    %372 = vector.shape_cast %371 : vector<1x4x17xbf16> to vector<4x17xbf16>
    %373 = vector.extract_strided_slice %4 {offsets = [11, 0, 5], sizes = [1, 4, 17], strides = [1, 1, 1]} : vector<14x4x22xbf16> to vector<1x4x17xbf16>
    %374 = vector.shape_cast %373 : vector<1x4x17xbf16> to vector<4x17xbf16>
    %375 = tpu.concatenate %370, %372, %374 in 0 : vector<4x17xbf16>, vector<4x17xbf16>, vector<4x17xbf16> -> vector<12x17xbf16>
    %376 = tpu.concatenate %368, %375 in 1 : vector<12x17xbf16>, vector<12x17xbf16> -> vector<12x34xbf16>
    %cst_48 = arith.constant dense<0.000000e+00> : vector<2x34xf32>
    %377 = tpu.matmul %5, %376, %cst_48 {dimension_numbers = #tpu.dot_dimension_numbers<[1], [0], [0], [1], [0, 0, 1, 1], [], []>} : vector<2x12xbf16>, vector<12x34xbf16>, vector<2x34xf32> -> vector<2x34xf32>
    %378 = vector.extract_strided_slice %4 {offsets = [8, 0, 3], sizes = [1, 4, 17], strides = [1, 1, 1]} : vector<14x4x22xbf16> to vector<1x4x17xbf16>
    %379 = vector.shape_cast %378 : vector<1x4x17xbf16> to vector<4x17xbf16>
    %380 = vector.extract_strided_slice %4 {offsets = [9, 0, 3], sizes = [1, 4, 17], strides = [1, 1, 1]} : vector<14x4x22xbf16> to vector<1x4x17xbf16>
    %381 = vector.shape_cast %380 : vector<1x4x17xbf16> to vector<4x17xbf16>
    %382 = vector.extract_strided_slice %4 {offsets = [10, 0, 3], sizes = [1, 4, 17], strides = [1, 1, 1]} : vector<14x4x22xbf16> to vector<1x4x17xbf16>
    %383 = vector.shape_cast %382 : vector<1x4x17xbf16> to vector<4x17xbf16>
    %384 = tpu.concatenate %379, %381, %383 in 0 : vector<4x17xbf16>, vector<4x17xbf16>, vector<4x17xbf16> -> vector<12x17xbf16>
    %385 = vector.extract_strided_slice %4 {offsets = [11, 0, 2], sizes = [1, 4, 17], strides = [1, 1, 1]} : vector<14x4x22xbf16> to vector<1x4x17xbf16>
    %386 = vector.shape_cast %385 : vector<1x4x17xbf16> to vector<4x17xbf16>
    %387 = vector.extract_strided_slice %4 {offsets = [12, 0, 2], sizes = [1, 4, 17], strides = [1, 1, 1]} : vector<14x4x22xbf16> to vector<1x4x17xbf16>
    %388 = vector.shape_cast %387 : vector<1x4x17xbf16> to vector<4x17xbf16>
    %389 = vector.extract_strided_slice %4 {offsets = [13, 0, 2], sizes = [1, 4, 17], strides = [1, 1, 1]} : vector<14x4x22xbf16> to vector<1x4x17xbf16>
    %390 = vector.shape_cast %389 : vector<1x4x17xbf16> to vector<4x17xbf16>
    %391 = tpu.concatenate %386, %388, %390 in 0 : vector<4x17xbf16>, vector<4x17xbf16>, vector<4x17xbf16> -> vector<12x17xbf16>
    %392 = tpu.concatenate %384, %391 in 1 : vector<12x17xbf16>, vector<12x17xbf16> -> vector<12x34xbf16>
    %cst_49 = arith.constant dense<0.000000e+00> : vector<2x34xf32>
    %393 = tpu.matmul %6, %392, %cst_49 {dimension_numbers = #tpu.dot_dimension_numbers<[1], [0], [0], [1], [0, 0, 1, 1], [], []>} : vector<2x12xbf16>, vector<12x34xbf16>, vector<2x34xf32> -> vector<2x34xf32>
    %394 = vector.extract_strided_slice %377 {offsets = [0, 0], sizes = [2, 17], strides = [1, 1]} : vector<2x34xf32> to vector<2x17xf32>
    %395 = vector.extract_strided_slice %377 {offsets = [0, 17], sizes = [2, 17], strides = [1, 1]} : vector<2x34xf32> to vector<2x17xf32>
    %396 = vector.extract_strided_slice %393 {offsets = [0, 0], sizes = [2, 17], strides = [1, 1]} : vector<2x34xf32> to vector<2x17xf32>
    %397 = vector.extract_strided_slice %393 {offsets = [0, 17], sizes = [2, 17], strides = [1, 1]} : vector<2x34xf32> to vector<2x17xf32>
    %398 = tpu.concatenate %394, %395, %396, %397 in 0 : vector<2x17xf32>, vector<2x17xf32>, vector<2x17xf32>, vector<2x17xf32> -> vector<8x17xf32>
    %399 = vector.broadcast %8 : vector<8x1xf32> to vector<8x17xf32>
    %400 = arith.addf %398, %399 : vector<8x17xf32>
    %cst_50 = arith.constant 0.000000e+00 : f32
    %401 = vector.broadcast %cst_50 : f32 to vector<8x17xf32>
    %402 = arith.cmpf oge, %400, %401 : vector<8x17xf32>
    %cst_51 = arith.constant 0.00999999977 : f32
    %403 = vector.broadcast %cst_51 : f32 to vector<8x17xf32>
    %404 = arith.mulf %403, %400 : vector<8x17xf32>
    %405 = arith.select %402, %400, %404 : vector<8x17xi1>, vector<8x17xf32>
    %406 = vector.extract_strided_slice %53 {offsets = [0, 0], sizes = [8, 16], strides = [1, 1]} : vector<8x17xf32> to vector<8x16xf32>
    %407 = vector.extract_strided_slice %53 {offsets = [0, 1], sizes = [8, 16], strides = [1, 1]} : vector<8x17xf32> to vector<8x16xf32>
    %408 = vector.extract_strided_slice %97 {offsets = [0, 0], sizes = [8, 16], strides = [1, 1]} : vector<8x17xf32> to vector<8x16xf32>
    %409 = vector.extract_strided_slice %97 {offsets = [0, 1], sizes = [8, 16], strides = [1, 1]} : vector<8x17xf32> to vector<8x16xf32>
    %410 = tpu.concatenate %406, %407, %408, %409 in 0 : vector<8x16xf32>, vector<8x16xf32>, vector<8x16xf32>, vector<8x16xf32> -> vector<32x16xf32>
    %cst_52 = arith.constant dense<0.000000e+00> : vector<8x16xf32>
    %411 = tpu.matmul %7, %410, %cst_52 {dimension_numbers = #tpu.dot_dimension_numbers<[1], [0], [0], [1], [0, 0, 1, 1], [], []>} : vector<8x32xf32>, vector<32x16xf32>, vector<8x16xf32> -> vector<8x16xf32>
    %412 = vector.broadcast %9 : vector<8x1xf32> to vector<8x16xf32>
    %413 = arith.addf %411, %412 : vector<8x16xf32>
    %cst_53 = arith.constant 0.000000e+00 : f32
    %414 = vector.broadcast %cst_53 : f32 to vector<8x16xf32>
    %415 = arith.cmpf oge, %413, %414 : vector<8x16xf32>
    %cst_54 = arith.constant 0.00999999977 : f32
    %416 = vector.broadcast %cst_54 : f32 to vector<8x16xf32>
    %417 = arith.mulf %416, %413 : vector<8x16xf32>
    %418 = arith.select %415, %413, %417 : vector<8x16xi1>, vector<8x16xf32>
    %419 = vector.extract_strided_slice %97 {offsets = [0, 0], sizes = [8, 16], strides = [1, 1]} : vector<8x17xf32> to vector<8x16xf32>
    %420 = vector.extract_strided_slice %97 {offsets = [0, 1], sizes = [8, 16], strides = [1, 1]} : vector<8x17xf32> to vector<8x16xf32>
    %421 = vector.extract_strided_slice %141 {offsets = [0, 0], sizes = [8, 16], strides = [1, 1]} : vector<8x17xf32> to vector<8x16xf32>
    %422 = vector.extract_strided_slice %141 {offsets = [0, 1], sizes = [8, 16], strides = [1, 1]} : vector<8x17xf32> to vector<8x16xf32>
    %423 = tpu.concatenate %419, %420, %421, %422 in 0 : vector<8x16xf32>, vector<8x16xf32>, vector<8x16xf32>, vector<8x16xf32> -> vector<32x16xf32>
    %cst_55 = arith.constant dense<0.000000e+00> : vector<8x16xf32>
    %424 = tpu.matmul %7, %423, %cst_55 {dimension_numbers = #tpu.dot_dimension_numbers<[1], [0], [0], [1], [0, 0, 1, 1], [], []>} : vector<8x32xf32>, vector<32x16xf32>, vector<8x16xf32> -> vector<8x16xf32>
    %425 = vector.broadcast %9 : vector<8x1xf32> to vector<8x16xf32>
    %426 = arith.addf %424, %425 : vector<8x16xf32>
    %cst_56 = arith.constant 0.000000e+00 : f32
    %427 = vector.broadcast %cst_56 : f32 to vector<8x16xf32>
    %428 = arith.cmpf oge, %426, %427 : vector<8x16xf32>
    %cst_57 = arith.constant 0.00999999977 : f32
    %429 = vector.broadcast %cst_57 : f32 to vector<8x16xf32>
    %430 = arith.mulf %429, %426 : vector<8x16xf32>
    %431 = arith.select %428, %426, %430 : vector<8x16xi1>, vector<8x16xf32>
    %432 = vector.extract_strided_slice %141 {offsets = [0, 0], sizes = [8, 16], strides = [1, 1]} : vector<8x17xf32> to vector<8x16xf32>
    %433 = vector.extract_strided_slice %141 {offsets = [0, 1], sizes = [8, 16], strides = [1, 1]} : vector<8x17xf32> to vector<8x16xf32>
    %434 = vector.extract_strided_slice %185 {offsets = [0, 0], sizes = [8, 16], strides = [1, 1]} : vector<8x17xf32> to vector<8x16xf32>
    %435 = vector.extract_strided_slice %185 {offsets = [0, 1], sizes = [8, 16], strides = [1, 1]} : vector<8x17xf32> to vector<8x16xf32>
    %436 = tpu.concatenate %432, %433, %434, %435 in 0 : vector<8x16xf32>, vector<8x16xf32>, vector<8x16xf32>, vector<8x16xf32> -> vector<32x16xf32>
    %cst_58 = arith.constant dense<0.000000e+00> : vector<8x16xf32>
    %437 = tpu.matmul %7, %436, %cst_58 {dimension_numbers = #tpu.dot_dimension_numbers<[1], [0], [0], [1], [0, 0, 1, 1], [], []>} : vector<8x32xf32>, vector<32x16xf32>, vector<8x16xf32> -> vector<8x16xf32>
    %438 = vector.broadcast %9 : vector<8x1xf32> to vector<8x16xf32>
    %439 = arith.addf %437, %438 : vector<8x16xf32>
    %cst_59 = arith.constant 0.000000e+00 : f32
    %440 = vector.broadcast %cst_59 : f32 to vector<8x16xf32>
    %441 = arith.cmpf oge, %439, %440 : vector<8x16xf32>
    %cst_60 = arith.constant 0.00999999977 : f32
    %442 = vector.broadcast %cst_60 : f32 to vector<8x16xf32>
    %443 = arith.mulf %442, %439 : vector<8x16xf32>
    %444 = arith.select %441, %439, %443 : vector<8x16xi1>, vector<8x16xf32>
    %445 = vector.extract_strided_slice %185 {offsets = [0, 0], sizes = [8, 16], strides = [1, 1]} : vector<8x17xf32> to vector<8x16xf32>
    %446 = vector.extract_strided_slice %185 {offsets = [0, 1], sizes = [8, 16], strides = [1, 1]} : vector<8x17xf32> to vector<8x16xf32>
    %447 = vector.extract_strided_slice %229 {offsets = [0, 0], sizes = [8, 16], strides = [1, 1]} : vector<8x17xf32> to vector<8x16xf32>
    %448 = vector.extract_strided_slice %229 {offsets = [0, 1], sizes = [8, 16], strides = [1, 1]} : vector<8x17xf32> to vector<8x16xf32>
    %449 = tpu.concatenate %445, %446, %447, %448 in 0 : vector<8x16xf32>, vector<8x16xf32>, vector<8x16xf32>, vector<8x16xf32> -> vector<32x16xf32>
    %cst_61 = arith.constant dense<0.000000e+00> : vector<8x16xf32>
    %450 = tpu.matmul %7, %449, %cst_61 {dimension_numbers = #tpu.dot_dimension_numbers<[1], [0], [0], [1], [0, 0, 1, 1], [], []>} : vector<8x32xf32>, vector<32x16xf32>, vector<8x16xf32> -> vector<8x16xf32>
    %451 = vector.broadcast %9 : vector<8x1xf32> to vector<8x16xf32>
    %452 = arith.addf %450, %451 : vector<8x16xf32>
    %cst_62 = arith.constant 0.000000e+00 : f32
    %453 = vector.broadcast %cst_62 : f32 to vector<8x16xf32>
    %454 = arith.cmpf oge, %452, %453 : vector<8x16xf32>
    %cst_63 = arith.constant 0.00999999977 : f32
    %455 = vector.broadcast %cst_63 : f32 to vector<8x16xf32>
    %456 = arith.mulf %455, %452 : vector<8x16xf32>
    %457 = arith.select %454, %452, %456 : vector<8x16xi1>, vector<8x16xf32>
    %458 = vector.extract_strided_slice %229 {offsets = [0, 0], sizes = [8, 16], strides = [1, 1]} : vector<8x17xf32> to vector<8x16xf32>
    %459 = vector.extract_strided_slice %229 {offsets = [0, 1], sizes = [8, 16], strides = [1, 1]} : vector<8x17xf32> to vector<8x16xf32>
    %460 = vector.extract_strided_slice %273 {offsets = [0, 0], sizes = [8, 16], strides = [1, 1]} : vector<8x17xf32> to vector<8x16xf32>
    %461 = vector.extract_strided_slice %273 {offsets = [0, 1], sizes = [8, 16], strides = [1, 1]} : vector<8x17xf32> to vector<8x16xf32>
    %462 = tpu.concatenate %458, %459, %460, %461 in 0 : vector<8x16xf32>, vector<8x16xf32>, vector<8x16xf32>, vector<8x16xf32> -> vector<32x16xf32>
    %cst_64 = arith.constant dense<0.000000e+00> : vector<8x16xf32>
    %463 = tpu.matmul %7, %462, %cst_64 {dimension_numbers = #tpu.dot_dimension_numbers<[1], [0], [0], [1], [0, 0, 1, 1], [], []>} : vector<8x32xf32>, vector<32x16xf32>, vector<8x16xf32> -> vector<8x16xf32>
    %464 = vector.broadcast %9 : vector<8x1xf32> to vector<8x16xf32>
    %465 = arith.addf %463, %464 : vector<8x16xf32>
    %cst_65 = arith.constant 0.000000e+00 : f32
    %466 = vector.broadcast %cst_65 : f32 to vector<8x16xf32>
    %467 = arith.cmpf oge, %465, %466 : vector<8x16xf32>
    %cst_66 = arith.constant 0.00999999977 : f32
    %468 = vector.broadcast %cst_66 : f32 to vector<8x16xf32>
    %469 = arith.mulf %468, %465 : vector<8x16xf32>
    %470 = arith.select %467, %465, %469 : vector<8x16xi1>, vector<8x16xf32>
    %471 = vector.extract_strided_slice %273 {offsets = [0, 0], sizes = [8, 16], strides = [1, 1]} : vector<8x17xf32> to vector<8x16xf32>
    %472 = vector.extract_strided_slice %273 {offsets = [0, 1], sizes = [8, 16], strides = [1, 1]} : vector<8x17xf32> to vector<8x16xf32>
    %473 = vector.extract_strided_slice %317 {offsets = [0, 0], sizes = [8, 16], strides = [1, 1]} : vector<8x17xf32> to vector<8x16xf32>
    %474 = vector.extract_strided_slice %317 {offsets = [0, 1], sizes = [8, 16], strides = [1, 1]} : vector<8x17xf32> to vector<8x16xf32>
    %475 = tpu.concatenate %471, %472, %473, %474 in 0 : vector<8x16xf32>, vector<8x16xf32>, vector<8x16xf32>, vector<8x16xf32> -> vector<32x16xf32>
    %cst_67 = arith.constant dense<0.000000e+00> : vector<8x16xf32>
    %476 = tpu.matmul %7, %475, %cst_67 {dimension_numbers = #tpu.dot_dimension_numbers<[1], [0], [0], [1], [0, 0, 1, 1], [], []>} : vector<8x32xf32>, vector<32x16xf32>, vector<8x16xf32> -> vector<8x16xf32>
    %477 = vector.broadcast %9 : vector<8x1xf32> to vector<8x16xf32>
    %478 = arith.addf %476, %477 : vector<8x16xf32>
    %cst_68 = arith.constant 0.000000e+00 : f32
    %479 = vector.broadcast %cst_68 : f32 to vector<8x16xf32>
    %480 = arith.cmpf oge, %478, %479 : vector<8x16xf32>
    %cst_69 = arith.constant 0.00999999977 : f32
    %481 = vector.broadcast %cst_69 : f32 to vector<8x16xf32>
    %482 = arith.mulf %481, %478 : vector<8x16xf32>
    %483 = arith.select %480, %478, %482 : vector<8x16xi1>, vector<8x16xf32>
    %484 = vector.extract_strided_slice %317 {offsets = [0, 0], sizes = [8, 16], strides = [1, 1]} : vector<8x17xf32> to vector<8x16xf32>
    %485 = vector.extract_strided_slice %317 {offsets = [0, 1], sizes = [8, 16], strides = [1, 1]} : vector<8x17xf32> to vector<8x16xf32>
    %486 = vector.extract_strided_slice %361 {offsets = [0, 0], sizes = [8, 16], strides = [1, 1]} : vector<8x17xf32> to vector<8x16xf32>
    %487 = vector.extract_strided_slice %361 {offsets = [0, 1], sizes = [8, 16], strides = [1, 1]} : vector<8x17xf32> to vector<8x16xf32>
    %488 = tpu.concatenate %484, %485, %486, %487 in 0 : vector<8x16xf32>, vector<8x16xf32>, vector<8x16xf32>, vector<8x16xf32> -> vector<32x16xf32>
    %cst_70 = arith.constant dense<0.000000e+00> : vector<8x16xf32>
    %489 = tpu.matmul %7, %488, %cst_70 {dimension_numbers = #tpu.dot_dimension_numbers<[1], [0], [0], [1], [0, 0, 1, 1], [], []>} : vector<8x32xf32>, vector<32x16xf32>, vector<8x16xf32> -> vector<8x16xf32>
    %490 = vector.broadcast %9 : vector<8x1xf32> to vector<8x16xf32>
    %491 = arith.addf %489, %490 : vector<8x16xf32>
    %cst_71 = arith.constant 0.000000e+00 : f32
    %492 = vector.broadcast %cst_71 : f32 to vector<8x16xf32>
    %493 = arith.cmpf oge, %491, %492 : vector<8x16xf32>
    %cst_72 = arith.constant 0.00999999977 : f32
    %494 = vector.broadcast %cst_72 : f32 to vector<8x16xf32>
    %495 = arith.mulf %494, %491 : vector<8x16xf32>
    %496 = arith.select %493, %491, %495 : vector<8x16xi1>, vector<8x16xf32>
    %497 = vector.extract_strided_slice %361 {offsets = [0, 0], sizes = [8, 16], strides = [1, 1]} : vector<8x17xf32> to vector<8x16xf32>
    %498 = vector.extract_strided_slice %361 {offsets = [0, 1], sizes = [8, 16], strides = [1, 1]} : vector<8x17xf32> to vector<8x16xf32>
    %499 = vector.extract_strided_slice %405 {offsets = [0, 0], sizes = [8, 16], strides = [1, 1]} : vector<8x17xf32> to vector<8x16xf32>
    %500 = vector.extract_strided_slice %405 {offsets = [0, 1], sizes = [8, 16], strides = [1, 1]} : vector<8x17xf32> to vector<8x16xf32>
    %501 = tpu.concatenate %497, %498, %499, %500 in 0 : vector<8x16xf32>, vector<8x16xf32>, vector<8x16xf32>, vector<8x16xf32> -> vector<32x16xf32>
    %cst_73 = arith.constant dense<0.000000e+00> : vector<8x16xf32>
    %502 = tpu.matmul %7, %501, %cst_73 {dimension_numbers = #tpu.dot_dimension_numbers<[1], [0], [0], [1], [0, 0, 1, 1], [], []>} : vector<8x32xf32>, vector<32x16xf32>, vector<8x16xf32> -> vector<8x16xf32>
    %503 = vector.broadcast %9 : vector<8x1xf32> to vector<8x16xf32>
    %504 = arith.addf %502, %503 : vector<8x16xf32>
    %cst_74 = arith.constant 0.000000e+00 : f32
    %505 = vector.broadcast %cst_74 : f32 to vector<8x16xf32>
    %506 = arith.cmpf oge, %504, %505 : vector<8x16xf32>
    %cst_75 = arith.constant 0.00999999977 : f32
    %507 = vector.broadcast %cst_75 : f32 to vector<8x16xf32>
    %508 = arith.mulf %507, %504 : vector<8x16xf32>
    %509 = arith.select %506, %504, %508 : vector<8x16xi1>, vector<8x16xf32>
    %510 = vector.shape_cast %418 : vector<8x16xf32> to vector<8x1x16xf32>
    %511 = vector.shape_cast %431 : vector<8x16xf32> to vector<8x1x16xf32>
    %512 = vector.shape_cast %444 : vector<8x16xf32> to vector<8x1x16xf32>
    %513 = vector.shape_cast %457 : vector<8x16xf32> to vector<8x1x16xf32>
    %514 = vector.shape_cast %470 : vector<8x16xf32> to vector<8x1x16xf32>
    %515 = vector.shape_cast %483 : vector<8x16xf32> to vector<8x1x16xf32>
    %516 = vector.shape_cast %496 : vector<8x16xf32> to vector<8x1x16xf32>
    %517 = vector.shape_cast %509 : vector<8x16xf32> to vector<8x1x16xf32>
    %518 = tpu.concatenate %510, %511, %512, %513, %514, %515, %516, %517 in 1 : vector<8x1x16xf32>, vector<8x1x16xf32>, vector<8x1x16xf32>, vector<8x1x16xf32>, vector<8x1x16xf32>, vector<8x1x16xf32>, vector<8x1x16xf32>, vector<8x1x16xf32> -> vector<8x8x16xf32>
    %c0_76 = arith.constant 0 : index
    %c0_77 = arith.constant 0 : index
    %c0_78 = arith.constant 0 : index
    %c0_79 = arith.constant 0 : index
    %519 = vector.load %arg9[%c0_76, %c0_77, %c0_78, %c0_79] : memref<1x8x8x16xf32, #tpu.memory_space<vmem>>, vector<1x8x8x16xf32>
    %520 = vector.shape_cast %519 : vector<1x8x8x16xf32> to vector<8x8x16xf32>
    %521 = vector.shape_cast %518 : vector<8x8x16xf32> to vector<1x8x8x16xf32>
    tpu.vector_store %arg9[%c0_76, %c0_77, %c0_78, %c0_79], %521 {strides = array<i32>} : memref<1x8x8x16xf32, #tpu.memory_space<vmem>>, vector<1x8x8x16xf32>,
    return
  }
  func.func @transform_0(%arg0: i32, %arg1: i32) -> (i32, i32, i32, i32) {
    %c0_i32 = arith.constant 0 : i32
    %c0_i32_0 = arith.constant 0 : i32
    %c0_i32_1 = arith.constant 0 : i32
    return %arg0, %arg1, %c0_i32, %c0_i32_0 : i32, i32, i32, i32
  }
  func.func @transform_1(%arg0: i32, %arg1: i32) -> (i32, i32, i32, i32) {
    %c1_i32 = arith.constant 1 : i32
    %0 = arith.addi %arg1, %c1_i32 : i32
    %c0_i32 = arith.constant 0 : i32
    %c0_i32_0 = arith.constant 0 : i32
    %c0_i32_1 = arith.constant 0 : i32
    return %arg0, %0, %c0_i32, %c0_i32_0 : i32, i32, i32, i32
  }
  func.func @transform_2(%arg0: i32, %arg1: i32) -> (i32, i32) {
    %c0_i32 = arith.constant 0 : i32
    %c0_i32_0 = arith.constant 0 : i32
    %c0_i32_1 = arith.constant 0 : i32
    return %c0_i32, %c0_i32_0 : i32, i32
  }
  func.func @transform_3(%arg0: i32, %arg1: i32) -> (i32, i32) {
    %c0_i32 = arith.constant 0 : i32
    %c0_i32_0 = arith.constant 0 : i32
    %c0_i32_1 = arith.constant 0 : i32
    return %c0_i32, %c0_i32_0 : i32, i32
  }
  func.func @transform_4(%arg0: i32, %arg1: i32) -> (i32, i32) {
    %c0_i32 = arith.constant 0 : i32
    %c0_i32_0 = arith.constant 0 : i32
    %c0_i32_1 = arith.constant 0 : i32
    return %c0_i32, %c0_i32_0 : i32, i32
  }
  func.func @transform_5(%arg0: i32, %arg1: i32) -> (i32, i32) {
    %c0_i32 = arith.constant 0 : i32
    %c0_i32_0 = arith.constant 0 : i32
    %c0_i32_1 = arith.constant 0 : i32
    return %c0_i32, %c0_i32_0 : i32, i32
  }
  func.func @transform_6(%arg0: i32, %arg1: i32) -> (i32, i32) {
    %c0_i32 = arith.constant 0 : i32
    %c0_i32_0 = arith.constant 0 : i32
    %c0_i32_1 = arith.constant 0 : i32
    return %c0_i32, %c0_i32_0 : i32, i32
  }
  func.func @transform_7(%arg0: i32, %arg1: i32) -> (i32, i32, i32, i32) {
    %c0_i32 = arith.constant 0 : i32
    %c0_i32_0 = arith.constant 0 : i32
    %c0_i32_1 = arith.constant 0 : i32
    return %arg0, %c0_i32, %arg1, %c0_i32_0 : i32, i32, i32, i32
  }
}

</mosaic_0001>

<bundles_post_ra>
// kernel: pconv_forward.1
= control target key start
LH: loop header
LB: loop body
LE: loop exit
PB: predicated region body
PF: predicated region fallthrough
CT: control target
= control target key end

     0   :  { %12 = vsyncpa [#allocation3], 0  ;;  %s4865_s0 = inlined_call_operand.vmem [shape: bf16[2,24,4,22], index: 0, kind: input, shape index: {}, may-alias: {0,1}]   ;;  %s4866_s1 = inlined_call_operand.vmem [shape: bf16[2,24,4,22], index: 1, kind: input, shape index: {}, may-alias: {0,1}]   ;;  %s4867_s2 = inlined_call_operand.vmem [shape: bf16[2,12], index: 2, kind: input, shape index: {}]   ;;  %s4868_s3 = inlined_call_operand.vmem [shape: bf16[2,12], index: 3, kind: input, shape index: {}]   ;;  %s4869_s4 = inlined_call_operand.vmem [shape: f32[8,1], index: 4, kind: input, shape index: {}]   ;;  %s4870_s5 = inlined_call_operand.vmem [shape: f32[8,32], index: 5, kind: input, shape index: {}]   ;;  %s4871_s6 = inlined_call_operand.vmem [shape: f32[8,1], index: 6, kind: input, shape index: {}]   ;;  %s4872_s7 = inlined_call_operand.hbm [shape: f32[2,8,16,16], index: 7, kind: output, shape index: {}]  }
   0x1   :  { %14 = vsyncpa [#allocation3 + $0x1], 0  ;;  %s3900_s24 = smov 0   ;;  %s3902_s25 = smov 0  }
   0x2   :  { %s3904_s26 = smov 0   ;;  %s3906_s27 = smov 0  }
   0x3   :  { %s3908_s28 = smov 0   ;;  %s3910_s29 = smov 0  }
   0x4   :  { %s3912_s30 = smov 0   ;;  %s3914_s8 = smov 0  }
   0x5 LB: > { %s3278_s9 = sadd.s32 4294967295, %s3842_s8   ;;  %s3279_s10 = sadd.s32 4294967294, %s3842_s8   ;;  %s3842_s8 = sphi %s3914_s8, %s20_s8   ;;  %s3838_s30 = sphi %s3912_s30, %s4881_s30   ;;  %s3834_s29 = sphi %s3910_s29, %s4880_s29   ;;  %s3830_s28 = sphi %s3908_s28, %s4879_s28   ;;  %s3826_s27 = sphi %s3906_s27, %s4878_s27   ;;  %s3822_s26 = sphi %s3904_s26, %s4877_s26   ;;  %s3818_s25 = sphi %s3902_s25, %s4876_s25   ;;  %s3814_s24 = sphi %s3900_s24, %s4875_s24  }
   0x6   : > { %s29_s11 = sadd.s32 1, %s3834_s29  ;;  %s32_s12 = sadd.s32 1, %s3838_s30 }
   0x7   : > { %p30_p0 = scmp.ge.s32.totalorder %s29_s11, 2  ;;  %p214_p1 = scmp.ne.s32.totalorder %s3822_s26, %s3818_s25 }
   0x8   : > { %p215_p2 = scmp.eq.s32.totalorder %s3278_s9, 3  ;;  %p220_p5 = scmp.ne.s32.totalorder %s3818_s25, %s3814_s24 }
   0x9   : > { %s4883_s11 = smov (%p30_p0, %s29_s11), 0  ;;  %s4885_s12 = smov (!%p30_p0, %s32_s12), %s3838_s30 }
   0xa   : > { %s200_s13 = ssub.s32 %s3834_s29, %s4883_s11  ;;  %p3951_p3 = por %p215_p2, %p214_p1 }
   0xb   : > { %p34_p4 = scmp.ge.s32.totalorder %s4885_s12, 2  ;;  %p221_p6 = scmp.eq.s32.totalorder %s3279_s10, 3 }
   0xc   : > { %p3282_p7 = scmp.ge.s32.totalorder %s3842_s8, 1  ;;  %p282_p9 = scmp.lt.s32.totalorder %s3842_s8, 5 }
   0xd   : > { %s4887_s12 = smov (%p34_p4, %s4885_s12), 0  ;;  %p3960_p8 = por %p221_p6, %p220_p5 }
   0xe   : > { %s199_s16 = ssub.s32 %s3838_s30, %s4887_s12  ;;  %s204_s17 = sadd.s32 1, %s3822_s26 }
   0xf   : > { %s201_s18 = sor.u32 %s200_s13, %s199_s16  ;;  %p283_p10 = pnand %p3282_p7, %p282_p9 }
  0x10   : > { %p202_p11 = scmp.eq.s32.totalorder %s201_s18, 0  ;;  %s3284_s20 = sshll.u32 (!%p283_p10), %s3826_s27, 3  ;;  %v375_v0 = vlaneseq (!%p283_p10)  ;;  %v3844_v1 = vmov (!%p283_p10), 1983009808   ;;  %vm391_vm0 = vcmask (!%p283_p10), 1041408   ;;  %vm395_vm1 = vcmask (!%p283_p10), 1043456  }
  0x11   : > { %286 = sbr.rel (%p283_p10) target bundleno = 1105 (0x451), region = 48  ;;  %p329_p12 = scmp.lt.s32.totalorder (!%p283_p10), %s3830_s28, 1  ;;  %v373_v2 = vunpack.c.l.s4 (!%p283_p10), %v3844_v1  ;;  %vm3849_vm2 = vmmov (!%p283_p10), 0   ;;  %vm427_vm3 = vcmask (!%p283_p10), 138240   ;;  %vm434_vm4 = vcmask (!%p283_p10), 1045504  }
  0x12   : > { %s3969_s19 = scalar_select %p202_p11, %s3822_s26, %s204_s17  }
  0x13   : > { %p331_p13 = scmp.lt.s32.totalorder (!%p283_p10), %s3284_s20, 23  ;;  %v374_v3 = vunpack.c.0.s8 (!%p283_p10), %v373_v2  ;;  %v3974_v4 = vshrl.u32 (!%p283_p10), %v375_v0, 7  ;;  %s3321_s9 = sadd.s32 (!%p283_p10), 8, %s3284_s20  ;;  %vm430_vm5 = vcmask (!%p283_p10), 97280   ;;  %vm1791_vm15 = vcmask (!%p283_p10), 261120  }
  0x14   : > { %p342_p0 = scmp.lt.s32.totalorder (!%p283_p10), %s3321_s9, 23  ;;  %s3850_s17 = smov (!%p283_p10), 14  }
  0x15   : > { %v3982_v5 = vsub.s32 (!%p283_p10), %v374_v3, %v3974_v4 }
  0x18   : > { %s330_s21 = scalar_select %p329_p12, %s3830_s28, 1 }
  0x19   : > { %s332_s22 = scalar_select %p331_p13, %s3284_s20, 23 }
  0x1a   : > { %s3642_s23 = smul.u32 24, %s330_s21  ;;  %s4889_s9 = smov (!%p342_p0, %s3321_s9), 23 }
  0x1c   : > { %s334_s10 = sadd.s32 %s3642_s23, %s332_s22  ;;  %s345_s20 = sadd.s32 %s3642_s23, %s4889_s9 }
  0x1d   : > { %s3285_s13 = sshll.u32 %s334_s10, 1  ;;  %s3287_s21 = sshll.u32 %s345_s20, 1 }
  0x1e   : > { %s3979_s18 = scalar_lea.vmem %s4865_s0, %s3285_s13  ;;  %s3845_s22 = smov 127  }
  0x1f   : > { %v3985_v6 = vld [vmem:[%s3979_s18 + $0x8] sm:$0x3]  ;;  %v3988_v7 = vld [vmem:[%s3979_s18 + $0x6] sm:$0x3]  ;;  %v3991_v8 = vld [vmem:[%s3979_s18 + $0xa] sm:$0x3]  ;;  %s4018_s16 = scalar_lea.vmem %s4866_s1, %s3287_s21 }
  0x20   : > { %v492_v9 = vcombine.low %v3985_v6, %v3985_v6  ;;  %v399_v10 = vcombine.low %v3988_v7, %v3988_v7  ;;  %v506_v11 = vrot.slane %v3985_v6, %v3982_v5  ;;  %v413_v12 = vrot.slane %v3988_v7, %v3982_v5  ;;  %v4006_v16 = vld [vmem:[%s3979_s18 + $0xc] sm:$0x3]  ;;  %v4009_v17 = vld [vmem:[%s3979_s18 + $0xe] sm:$0x3]  ;;  %v4025_v23 = vld [vmem:[%s4018_s16] sm:$0x3] }
  0x21   : > { %v660_v15 = vcombine.low %v3991_v8, %v3991_v8  ;;  %v514_v20 = vrot.slane %v3991_v8, %v3982_v5  ;;  %v675_v21 = vrot.slane %v4006_v16, %v3982_v5  ;;  %v958_v22 = vcombine.low %v4009_v17, %v4009_v17  ;;  %v4031_v26 = vld [vmem:[%s3979_s18 + $0x4] sm:$0x3]  ;;  %s3846_s23 = smov 126   ;;  %v352_v42 = vld [vmem:[%s3979_s18 + $0x2] sm:$0x3]  ;;  %s3847_s9 = smov 125  }
  0x22   : > { %v499_v13 = vrot.slane %v492_v9, %v3982_v5  ;;  %v406_v14 = vrot.slane %v399_v10, %v3982_v5  ;;  %v600_v18 = vcombine.low %v506_v11, %v506_v11  ;;  %v416_v19 = vcombine.low %v413_v12, %v413_v12  ;;  %v4065_v45 = vld [vmem:[%s4018_s16 + $0x2] sm:$0x3]  ;;  %v4072_v48 = vld [vmem:[%s4018_s16 + $0x4] sm:$0x3]  ;;  %v351_v10 = vld [vmem:[%s3979_s18] sm:$0x3] }
  0x23   : > { %v667_v24 = vrot.slane %v660_v15, %v3982_v5  ;;  %v973_v25 = vrot.slane %v4025_v23, %v3982_v5  ;;  %v371_v27 = vcombine.low %v4031_v26, %v4031_v26  ;;  %v515_v29 = vcombine.low %v514_v20, %v514_v20  ;;  %v4123_v12 = vld [vmem:[%s4018_s16 + $0x6] sm:$0x3]  ;;  %s3851_s18 = smov 15   ;;  %s3316_s10 = sshll.u32 %s3830_s28, 4 }
  0x24   : > { %598 = vrot.lane.b32.xlu1 %v499_v13, %s3845_s22  ;;  %414 = vrot.lane.b32.xlu0 %v406_v14, %s3845_s22  ;;  %v517_v28 = vsel %vm391_vm0, %v3988_v7, %v499_v13  ;;  %v811_v30 = vcombine.low %v4006_v16, %v4006_v16  ;;  %v676_v32 = vcombine.low %v675_v21, %v675_v21 }
  0x25   : > { %v678_v31 = vsel %vm391_vm0, %v3985_v6, %v667_v24  ;;  %v965_v33 = vrot.slane %v958_v22, %v3982_v5  ;;  %v826_v34 = vrot.slane %v4009_v17, %v3982_v5  ;;  %v974_v35 = vcombine.low %v973_v25, %v973_v25 }
  0x26   : > { %v4047_v36 = vsel %vm395_vm1, %v517_v28, %v515_v29  ;;  %v378_v37 = vrot.slane %v371_v27, %v3982_v5  ;;  %v4051_v38 = vsel %vm395_vm1, %v678_v31, %v676_v32  ;;  %v808_v39 = vsel %vm391_vm0, %v4031_v26, %v406_v14 }
  0x27   : > { %v976_v40 = vsel %vm391_vm0, %v4006_v16, %v965_v33  ;;  %v818_v41 = vrot.slane %v811_v30, %v3982_v5  ;;  %v4062_v43 = vsel %vm395_vm1, %v808_v39, %v600_v18  ;;  %v827_v44 = vcombine.low %v826_v34, %v826_v34 }
  0x28   : > { %601 = vrot.lane.b32.xlu1 %v600_v18, %s3846_s23  ;;  %417 = vrot.lane.b32.xlu0 %v416_v19, %s3846_s23  ;;  %v657_v46 = vsel %vm391_vm0, %v352_v42, %v378_v37  ;;  %v4069_v47 = vsel %vm395_vm1, %v976_v40, %v974_v35  ;;  %v1104_v52 = vcombine.low %v4025_v23, %v4025_v23 }
  0x29   : > { %v4075_v49 = vsel %vm395_vm1, %v657_v46, %v416_v19  ;;  %v829_v50 = vsel %vm391_vm0, %v3991_v8, %v818_v41  ;;  %v1250_v53 = vcombine.low %v4065_v45, %v4065_v45  ;;  %v1265_v54 = vrot.slane %v4072_v48, %v3982_v5 }
  0x2a   : > { %v4080_v51 = vsel %vm395_vm1, %v829_v50, %v827_v44  ;;  %v1119_v55 = vrot.slane %v4065_v45, %v3982_v5  ;;  %v1111_v56 = vrot.slane %v1104_v52, %v3982_v5  ;;  %v1396_v62 = vcombine.low %v4072_v48, %v4072_v48  ;;  %v363_v50 = vld [vmem:[%s4018_s16 + $0x8] sm:$0x3] }
  0x2b   : > { %v1257_v57 = vrot.slane %v1250_v53, %v3982_v5  ;;  %v1266_v58 = vcombine.low %v1265_v54, %v1265_v54  ;;  %v478_v1 = vcombine.low %v352_v42, %v352_v42  ;;  %v385_v3 = vrot.slane %v4031_v26, %v3982_v5 }
  0x2c   : > { %751 = vrot.lane.b32.xlu0 %v667_v24, %s3845_s22  ;;  %753 = vrot.lane.b32.xlu1 %v515_v29, %s3846_s23  ;;  %v1120_v60 = vcombine.low %v1119_v55, %v1119_v55  ;;  %v1122_v63 = vsel %vm391_vm0, %v4009_v17, %v1111_v56  ;;  %v4113_v2 = vrot.slane %v1396_v62, %v3982_v5  ;;  %v3848_v19 = vmov 0.0  }
  0x2d   : > { %v1268_v59 = vsel %vm391_vm0, %v4025_v23, %v1257_v57  ;;  %v485_v9 = vrot.slane %v478_v1, %v3982_v5  ;;  %v388_v11 = vcombine.low %v385_v3, %v385_v3  ;;  %v1542_v14 = vcombine.low %v4123_v12, %v4123_v12  ;;  %3398 = vmatprep.subr.bf16.mxu0 %v3848_v19 }
  0x2e   : > { %v4099_v61 = vsel %vm395_vm1, %v1268_v59, %v1266_v58  ;;  %v4108_v0 = vsel %vm395_vm1, %v1122_v63, %v1120_v60  ;;  %3404 = vmatprep.subr.bf16.mxu1 %v3848_v19  ;;  %3400 = vmatprep.mubr.msk.bf16.mxu0 %vm3849_vm2, %v3848_v19  ;;  %v1688_v63 = vcombine.low %v363_v50, %v363_v50 }
  0x2f   : > { %v488_v13 = vsel %vm391_vm0, %v351_v10, %v485_v9  ;;  %v4133_v18 = vrot.slane %v1542_v14, %v3982_v5  ;;  %3406 = vmatprep.mubr.msk.bf16.mxu1 %vm3849_vm2, %v3848_v19 }
  0x30   : > { %902 = vrot.lane.b32.xlu0 %v818_v41, %s3845_s22  ;;  %904 = vrot.lane.b32.xlu1 %v676_v32, %s3846_s23  ;;  %v490_v15 = vsel %vm395_vm1, %v488_v13, %v388_v11  ;;  %v3305_v13 = vld.sshfl [vmem:[%s4018_s16 + $0xa] sm:$0x3 pattern:$0x76325410]  ;;  %v1695_v14 = vrot.slane %v1688_v63, %v3982_v5  ;;  %s3176_s16 = sadd.s32 %s3826_s27, %s3316_s10  ;;  %s3856_s10 = smov [#allocation2]  }
  0x31   : > { %s3317_s28 = sshll.u32 %s3176_s16, 7 }
  0x34   : > { %1048 = vrot.lane.b32.xlu0 %v965_v33, %s3845_s22  ;;  %1050 = vrot.lane.b32.xlu1 %v827_v44, %s3846_s23 }
  0x38   : > { %1194 = vrot.lane.b32.xlu0 %v1111_v56, %s3845_s22  ;;  %1196 = vrot.lane.b32.xlu1 %v974_v35, %s3846_s23  ;;  %v1560_v56 = vsel %vm391_vm0, %v4072_v48, %v4133_v18 }
  0x3c   : > { %1340 = vrot.lane.b32.xlu0 %v1257_v57, %s3845_s22  ;;  %1342 = vrot.lane.b32.xlu1 %v1120_v60, %s3846_s23 }
  0x40   : > { %1486 = vrot.lane.b32.xlu0 %v4113_v2, %s3845_s22  ;;  %1488 = vrot.lane.b32.xlu1 %v1266_v58, %s3846_s23  ;;  %v1414_v58 = vsel %vm391_vm0, %v4065_v45, %v4113_v2 }
  0x44   : > { %389 = vrot.lane.b32.xlu1 %v388_v11, %s3846_s23  ;;  %386 = vrot.lane.b32.xlu0 %v378_v37, %s3845_s22 }
  0x48   : > { %521 = vrot.lane.b32.xlu1 %v490_v15, %s3847_s9 }
  0x4c   : > { %1632 = vrot.lane.b32.xlu1 %v4133_v18, %s3845_s22 }
  0x96   : > { %v599_v20 = vpop.permute.xlu1 %598  ;;  %v415_v21 = vpop.permute.xlu0 %414 }
  0x97   : > { %v605_v22 = vsel %vm391_vm0, %v3985_v6, %v599_v20  ;;  %v421_v24 = vsel %vm391_vm0, %v3988_v7, %v415_v21  ;;  %v1411_v6 = vrot.slane %v4123_v12, %v3982_v5 }
  0x99   : > { %v1412_v31 = vcombine.low %v1411_v6, %v1411_v6 }
  0x9a   : > { %v602_v25 = vpop.permute.xlu1 %601  ;;  %v418_v27 = vpop.permute.xlu0 %417 }
  0x9b   : > { %v4148_v28 = vsel %vm395_vm1, %v421_v24, %v418_v27  ;;  %v4151_v29 = vsel %vm395_vm1, %v605_v22, %v602_v25  ;;  %v4267_v22 = vld [vmem:[%s4868_s3] sm:$0x1]  ;;  %v1706_v27 = vsel %vm391_vm0, %v4123_v12, %v1695_v14 }
  0x9c   : > { %425 = vrot.lane.b32.xlu0 %v4148_v28, %s3850_s17  ;;  %609 = vrot.lane.b32.xlu1 %v4151_v29, %s3850_s17 }
  0x9e   : > { %v752_v30 = vpop.permute.xlu0 %751  ;;  %v754_v7 = vpop.permute.xlu1 %753 }
  0x9f   : > { %v757_v37 = vsel %vm391_vm0, %v3991_v8, %v752_v30  ;;  %v3852_v30 = vmov 0  }
  0xa0   : > { %524 = vrot.lane.b32.xlu0 %v4047_v36, %s3851_s18  ;;  %685 = vrot.lane.b32.xlu1 %v4051_v38, %s3851_s18 }
  0xa1   : > { %3729 = vset.pattern.permute.xlu1 %v3852_v30  ;;  %3735 = vset.pattern.permute.xlu0 %v3852_v30 }
  0xa2   : > { %v903_v32 = vpop.permute.xlu0 %902  ;;  %v905_v33 = vpop.permute.xlu1 %904 }
  0xa3   : > { %v908_v34 = vsel %vm391_vm0, %v4006_v16, %v903_v32  ;;  %v4178_v16 = vsel %vm395_vm1, %v757_v37, %v754_v7 }
  0xa4   : > { %1634 = vrot.lane.b32.xlu0 %v1412_v31, %s3846_s23  ;;  %833 = vrot.lane.b32.xlu1 %v4062_v43, %s3847_s9  ;;  %v4169_v35 = vsel %vm395_vm1, %v908_v34, %v905_v33 }
  0xa6   : > { %v1049_v39 = vpop.permute.xlu0 %1048  ;;  %v1051_v40 = vpop.permute.xlu1 %1050 }
  0xa7   : > { %v1054_v46 = vsel %vm391_vm0, %v4009_v17, %v1049_v39  ;;  %v1557_v17 = vrot.slane %v363_v50, %v3982_v5  ;;  %v1704_v5 = vcombine.low %v3305_v13, %v3305_v13 }
  0xa8   : > { %682 = vrot.lane.b32.xlu0 %v4075_v49, %s3847_s9  ;;  %912 = vrot.lane.b32.xlu1 %v4169_v35, %s3850_s17  ;;  %v4200_v49 = vsel %vm395_vm1, %v1054_v46, %v1051_v40 }
  0xa9   : > { %v1558_v54 = vcombine.low %v1557_v17, %v1557_v17  ;;  %v1708_v7 = vsel %vm395_vm1, %v1706_v27, %v1704_v5 }
  0xaa   : > { %v1195_v41 = vpop.permute.xlu0 %1194  ;;  %v1197_v42 = vpop.permute.xlu1 %1196 }
  0xab   : > { %v1200_v8 = vsel %vm391_vm0, %v4025_v23, %v1195_v41 }
  0xac   : > { %761 = vrot.lane.b32.xlu0 %v4178_v16, %s3850_s17  ;;  %982 = vrot.lane.b32.xlu1 %v4069_v47, %s3851_s18  ;;  %v4191_v43 = vsel %vm395_vm1, %v1200_v8, %v1197_v42 }
  0xae   : > { %v1341_v44 = vpop.permute.xlu0 %1340  ;;  %v1343_v23 = vpop.permute.xlu1 %1342 }
  0xaf   : > { %v1346_v55 = vsel %vm391_vm0, %v4065_v45, %v1341_v44 }
  0xb0   : > { %836 = vrot.lane.b32.xlu0 %v4080_v51, %s3851_s18  ;;  %1125 = vrot.lane.b32.xlu1 %v4051_v38, %s3847_s9  ;;  %v4227_v57 = vsel %vm395_vm1, %v1346_v55, %v1343_v23 }
  0xb2   : > { %v1487_v52 = vpop.permute.xlu0 %1486  ;;  %v1489_v38 = vpop.permute.xlu1 %1488 }
  0xb4   : > { %979 = vrot.lane.b32.xlu0 %v4047_v36, %s3847_s9  ;;  %1204 = vrot.lane.b32.xlu1 %v4191_v43, %s3850_s17  ;;  %v1492_v36 = vsel %vm391_vm0, %v4072_v48, %v1487_v52  ;;  %v1416_v48 = vsel %vm395_vm1, %v1414_v58, %v1412_v31 }
  0xb5   : > { %v4215_v53 = vsel %vm395_vm1, %v1492_v36, %v1489_v38 }
  0xb6   : > { %v387_v60 = vpop.permute.xlu0 %386 }
  0xb7   : > { %v394_v45 = vsel %vm391_vm0, %v4031_v26, %v387_v60  ;;  %v4252_v26 = vld [vmem:[%s4867_s2] sm:$0x1] }
  0xb8   : > { %1058 = vrot.lane.b32.xlu0 %v4200_v49, %s3850_s17  ;;  %1274 = vrot.lane.b32.xlu1 %v4099_v61, %s3851_s18 }
  0xbc   : > { %1128 = vrot.lane.b32.xlu0 %v4108_v0, %s3851_s18  ;;  %1417 = vrot.lane.b32.xlu1 %v4069_v47, %s3847_s9  ;;  %v1562_v47 = vsel %vm395_vm1, %v1560_v56, %v1558_v54 }
  0xc0   : > { %1271 = vrot.lane.b32.xlu0 %v4080_v51, %s3847_s9  ;;  %1496 = vrot.lane.b32.xlu1 %v4215_v53, %s3850_s17  ;;  %v390_v51 = vpop.permute.xlu1 %389 }
  0xc1   : > { %v397_v3 = vsel %vm395_vm1, %v394_v45, %v390_v51 }
  0xc4   : > { %1350 = vrot.lane.b32.xlu0 %v4227_v57, %s3850_s17  ;;  %1566 = vrot.lane.b32.xlu1 %v1562_v47, %s3851_s18  ;;  %v522_v59 = vpop.permute.xlu1 %521 }
  0xc8   : > { %1420 = vrot.lane.b32.xlu0 %v1416_v48, %s3851_s18  ;;  %1709 = vrot.lane.b32.xlu1 %v4099_v61, %s3847_s9  ;;  %v1633_v62 = vpop.permute.xlu1 %1632 }
  0xc9   : > { %v1638_v18 = vsel %vm391_vm0, %v4123_v12, %v1633_v62 }
  0xcc   : > { %1563 = vrot.lane.b32.xlu0 %v4108_v0, %s3847_s9  ;;  %s3853_s9 = smov 111  }
 0x10e   : > { %v426_v1 = vpop.permute.xlu0 %425  ;;  %v610_v2 = vpop.permute.xlu1 %609 }
 0x10f   : > { %v429_v61 = vsel %vm427_vm3, %v397_v3, %v426_v1  ;;  %v612_v0 = vsel %vm427_vm3, %v4148_v28, %v610_v2  ;;  %v368_v28 = vld [vmem:[%s4869_s4] sm:$0xff] }
 0x110   : > { %v435_v9 = vsel %vm434_vm4, %v429_v61, 0  ;;  %v613_v20 = vsel %vm434_vm4, %v612_v0, 0  ;;  %591 = vperm.xlu1 %3729, %v368_v28  }
 0x111   : > { %3399 = vmatpush3.bf16.msra.mxu0 %v435_v9 }
 0x112   : > { %v525_v10 = vpop.permute.xlu0 %524  ;;  %v686_v11 = vpop.permute.xlu1 %685  ;;  %3410 = vmatprep.subr.bf16.mxu0 %v3848_v19 }
 0x113   : > { %v528_v15 = vsel %vm427_vm3, %v522_v59, %v525_v10 }
 0x114   : > { %3401 = vmatmul.mubr.msk.bf16.vlgmr.msra.gmra.mrb[0].mxu0 %vm430_vm5, %v4252_v26  ;;  %v532_v21 = vsel %vm434_vm4, %v528_v15, 0 }
 0x115   : > { %3405 = vmatpush3.bf16.msra.mxu1 %v532_v21  ;;  %3411 = vmatpush3.bf16.msra.mxu0 %v613_v20 }
 0x116   : > { %v1635_v24 = vpop.permute.xlu0 %1634  ;;  %v834_v25 = vpop.permute.xlu1 %833  ;;  %3412 = vmatprep.mubr.msk.bf16.mxu0 %vm3849_vm2, %v3848_v19  ;;  %3416 = vmatprep.subr.bf16.mxu1 %v3848_v19 }
 0x117   : > { %v1640_v6 = vsel %vm395_vm1, %v1638_v18, %v1635_v24  ;;  %3422 = vmatprep.subr.bf16.mxu0 %v3848_v19 }
 0x118   : > { %3407 = vmatmul.mubr.msk.bf16.vlgmr.msra.gmra.mrb[0].mxu1 %vm430_vm5, %v4267_v22  ;;  %1642 = vrot.lane.b32.xlu0 %v1640_v6, %s3850_s17 }
 0x119   : > { %3418 = vmatprep.mubr.msk.bf16.mxu1 %vm3849_vm2, %v3848_v19 }
 0x11a   : > { %v683_v12 = vpop.permute.xlu0 %682  ;;  %v913_v31 = vpop.permute.xlu1 %912 }
 0x11b   : > { %v689_v32 = vsel %vm427_vm3, %v683_v12, %v686_v11  ;;  %v915_v41 = vsel %vm427_vm3, %v4178_v16, %v913_v31 }
 0x11c   : > { %v690_v33 = vsel %vm434_vm4, %v689_v32, 0  ;;  %1712 = vrot.lane.b32.xlu0 %v1708_v7, %s3851_s18  ;;  %3413 = vmatmul.mubr.msk.bf16.vlgmr.msra.gmra.mrb[4].mxu0 %vm430_vm5, %v4252_v26  ;;  %v916_v44 = vsel %vm434_vm4, %v915_v41, 0  ;;  %s4795_s18 = scalar_lea.hbm %s4872_s7, %s3317_s28 }
 0x11d   : > { %3417 = vmatpush3.bf16.msra.mxu1 %v690_v33  ;;  %3424 = vmatprep.mubr.msk.bf16.mxu0 %vm3849_vm2, %v3848_v19 }
 0x11e   : > { %v762_v34 = vpop.permute.xlu0 %761  ;;  %v983_v37 = vpop.permute.xlu1 %982  ;;  %3428 = vmatprep.subr.bf16.mxu1 %v3848_v19 }
 0x11f   : > { %v764_v39 = vsel %vm427_vm3, %v4151_v29, %v762_v34 }
 0x120   : > { %v765_v40 = vsel %vm434_vm4, %v764_v39, 0  ;;  %3419 = vmatmul.mubr.msk.bf16.vlgmr.msra.gmra.mrb[4].mxu1 %vm430_vm5, %v4267_v22 }
 0x121   : > { %3423 = vmatpush3.bf16.msra.mxu0 %v765_v40  ;;  %3430 = vmatprep.mubr.msk.bf16.mxu1 %vm3849_vm2, %v3848_v19 }
 0x122   : > { %v837_v8 = vpop.permute.xlu0 %836  ;;  %3434 = vmatprep.subr.bf16.mxu0 %v3848_v19  ;;  %v1126_v46 = vpop.permute.xlu1 %1125 }
 0x123   : > { %v840_v42 = vsel %vm427_vm3, %v834_v25, %v837_v8 }
 0x124   : > { %v841_v29 = vsel %vm434_vm4, %v840_v42, 0  ;;  %3425 = vmatmul.mubr.msk.bf16.vlgmr.msra.gmra.mrb[8].mxu0 %vm430_vm5, %v4252_v26 }
 0x125   : > { %3429 = vmatpush3.bf16.msra.mxu1 %v841_v29  ;;  %3435 = vmatpush3.bf16.msra.mxu0 %v916_v44 }
 0x126   : > { %v980_v16 = vpop.permute.xlu0 %979  ;;  %3436 = vmatprep.mubr.msk.bf16.mxu0 %vm3849_vm2, %v3848_v19  ;;  %3440 = vmatprep.subr.bf16.mxu1 %v3848_v19  ;;  %v1205_v52 = vpop.permute.xlu1 %1204 }
 0x127   : > { %v986_v23 = vsel %vm427_vm3, %v980_v16, %v983_v37  ;;  %3446 = vmatprep.subr.bf16.mxu0 %v3848_v19 }
 0x128   : > { %v987_v50 = vsel %vm434_vm4, %v986_v23, 0  ;;  %3431 = vmatmul.mubr.msk.bf16.vlgmr.msra.gmra.mrb[8].mxu1 %vm430_vm5, %v4267_v22 }
 0x129   : > { %3441 = vmatpush3.bf16.msra.mxu1 %v987_v50  ;;  %3442 = vmatprep.mubr.msk.bf16.mxu1 %vm3849_vm2, %v3848_v19 }
 0x12a   : > { %v1059_v17 = vpop.permute.xlu0 %1058  ;;  %3452 = vmatprep.subr.bf16.mxu1 %v3848_v19  ;;  %v1275_v56 = vpop.permute.xlu1 %1274 }
 0x12b   : > { %v1061_v36 = vsel %vm427_vm3, %v4169_v35, %v1059_v17  ;;  %v1207_v35 = vsel %vm427_vm3, %v4200_v49, %v1205_v52 }
 0x12c   : > { %v1062_v38 = vsel %vm434_vm4, %v1061_v36, 0  ;;  %3437 = vmatmul.mubr.msk.bf16.vlgmr.msra.gmra.mrb[12].mxu0 %vm430_vm5, %v4252_v26  ;;  %v1208_v51 = vsel %vm434_vm4, %v1207_v35, 0 }
 0x12d   : > { %3447 = vmatpush3.bf16.msra.mxu0 %v1062_v38  ;;  %3448 = vmatprep.mubr.msk.bf16.mxu0 %vm3849_vm2, %v3848_v19 }
 0x12e   : > { %v1129_v54 = vpop.permute.xlu0 %1128  ;;  %3458 = vmatprep.subr.bf16.mxu0 %v3848_v19  ;;  %v1418_v59 = vpop.permute.xlu1 %1417 }
 0x12f   : > { %v1132_v55 = vsel %vm427_vm3, %v1126_v46, %v1129_v54 }
 0x130   : > { %v1133_v47 = vsel %vm434_vm4, %v1132_v55, 0  ;;  %3443 = vmatmul.mubr.msk.bf16.vlgmr.msra.gmra.mrb[12].mxu1 %vm430_vm5, %v4267_v22 }
 0x131   : > { %3453 = vmatpush3.bf16.msra.mxu1 %v1133_v47  ;;  %3454 = vmatprep.mubr.msk.bf16.mxu1 %vm3849_vm2, %v3848_v19 }
 0x132   : > { %v1272_v58 = vpop.permute.xlu0 %1271  ;;  %3464 = vmatprep.subr.bf16.mxu1 %v3848_v19  ;;  %v1497_v1 = vpop.permute.xlu1 %1496 }
 0x133   : > { %v1278_v48 = vsel %vm427_vm3, %v1272_v58, %v1275_v56  ;;  %v1499_v9 = vsel %vm427_vm3, %v4227_v57, %v1497_v1 }
 0x134   : > { %3449 = vmatmul.mubr.msk.bf16.vlgmr.msra.gmra.mrb[16].mxu0 %vm430_vm5, %v4252_v26  ;;  %v1279_v49 = vsel %vm434_vm4, %v1278_v48, 0  ;;  %v1500_v10 = vsel %vm434_vm4, %v1499_v9, 0 }
 0x135   : > { %3459 = vmatpush3.bf16.msra.mxu0 %v1208_v51  ;;  %3460 = vmatprep.mubr.msk.bf16.mxu0 %vm3849_vm2, %v3848_v19 }
 0x136   : > { %v1351_v60 = vpop.permute.xlu0 %1350  ;;  %3470 = vmatprep.subr.bf16.mxu0 %v3848_v19  ;;  %v1567_v61 = vpop.permute.xlu1 %1566 }
 0x137   : > { %v1353_v62 = vsel %vm427_vm3, %v4191_v43, %v1351_v60 }
 0x138   : > { %3455 = vmatmul.mubr.msk.bf16.vlgmr.msra.gmra.mrb[16].mxu1 %vm430_vm5, %v4267_v22  ;;  %v1354_v2 = vsel %vm434_vm4, %v1353_v62, 0 }
 0x139   : > { %3465 = vmatpush3.bf16.msra.mxu1 %v1279_v49  ;;  %3466 = vmatprep.mubr.msk.bf16.mxu1 %vm3849_vm2, %v3848_v19 }
 0x13a   : > { %v1421_v45 = vpop.permute.xlu0 %1420  ;;  %3476 = vmatprep.subr.bf16.mxu1 %v3848_v19  ;;  %v1710_v15 = vpop.permute.xlu1 %1709 }
 0x13b   : > { %v1424_v63 = vsel %vm427_vm3, %v1418_v59, %v1421_v45 }
 0x13c   : > { %3461 = vmatmul.mubr.msk.bf16.vlgmr.msra.gmra.mrb[20].mxu0 %vm430_vm5, %v4252_v26  ;;  %v1425_v43 = vsel %vm434_vm4, %v1424_v63, 0 }
 0x13d   : > { %3471 = vmatpush3.bf16.msra.mxu0 %v1354_v2  ;;  %3472 = vmatprep.mubr.msk.bf16.mxu0 %vm3849_vm2, %v3848_v19 }
 0x13e   : > { %3482 = vmatprep.subr.bf16.mxu0 %v3848_v19  ;;  %v1564_v3 = vpop.permute.xlu0 %1563 }
 0x13f   : > { %v1570_v0 = vsel %vm427_vm3, %v1564_v3, %v1567_v61 }
 0x140   : > { %3467 = vmatmul.mubr.msk.bf16.vlgmr.msra.gmra.mrb[20].mxu1 %vm430_vm5, %v4267_v22  ;;  %v1571_v11 = vsel %vm434_vm4, %v1570_v0, 0 }
 0x141   : > { %3477 = vmatpush3.bf16.msra.mxu1 %v1425_v43  ;;  %3478 = vmatprep.mubr.msk.bf16.mxu1 %vm3849_vm2, %v3848_v19 }
 0x142   : > { %3488 = vmatprep.subr.bf16.mxu1 %v3848_v19 }
 0x144   : > { %3473 = vmatmul.mubr.msk.bf16.vlgmr.msra.gmra.mrb[24].mxu0 %vm430_vm5, %v4252_v26 }
 0x145   : > { %3483 = vmatpush3.bf16.msra.mxu0 %v1500_v10  ;;  %3484 = vmatprep.mubr.msk.bf16.mxu0 %vm3849_vm2, %v3848_v19 }
 0x146   : > { %3494 = vmatprep.subr.bf16.mxu0 %v3848_v19 }
 0x148   : > { %3479 = vmatmul.mubr.msk.bf16.vlgmr.msra.gmra.mrb[24].mxu1 %vm430_vm5, %v4267_v22 }
 0x149   : > { %3489 = vmatpush3.bf16.msra.mxu1 %v1571_v11  ;;  %3490 = vmatprep.mubr.msk.bf16.mxu1 %vm3849_vm2, %v3848_v19 }
 0x14a   : > { %3500 = vmatprep.subr.bf16.mxu1 %v3848_v19 }
 0x14c   : > { %3485 = vmatmul.mubr.msk.bf16.vlgmr.msra.gmra.mrb[28].mxu0 %vm430_vm5, %v4252_v26 }
 0x14d   : > { %3496 = vmatprep.mubr.msk.bf16.mxu0 %vm3849_vm2, %v3848_v19 }
 0x150   : > { %3491 = vmatmul.mubr.msk.bf16.vlgmr.msra.gmra.mrb[28].mxu1 %vm430_vm5, %v4267_v22 }
 0x151   : > { %3502 = vmatprep.mubr.msk.bf16.mxu1 %vm3849_vm2, %v3848_v19 }
 0x18a   : > { %v1643_v57 = vpop.permute.xlu0 %1642 }
 0x18b   : > { %v1645_v13 = vsel %vm427_vm3, %v4215_v53, %v1643_v57 }
 0x18c   : > { %v1646_v14 = vsel %vm434_vm4, %v1645_v13, 0 }
 0x18d   : > { %3495 = vmatpush3.bf16.msra.mxu0 %v1646_v14 }
 0x18e   : > { %v1713_v18 = vpop.permute.xlu0 %1712 }
 0x18f   : > { %v1716_v20 = vsel %vm427_vm3, %v1710_v15, %v1713_v18 }
 0x190   : > { %v1717_v21 = vsel %vm434_vm4, %v1716_v20, 0  ;;  %3497 = vmatmul.mubr.msk.bf16.vlgmr.msra.gmra.mrb[32].mxu0 %vm430_vm5, %v4252_v26 }
 0x191   : > { %3501 = vmatpush3.bf16.msra.mxu1 %v1717_v21  ;;  %3514 = vmatprep.mubr.msk.f32.mxu0 %vm3849_vm2, %v3848_v19 }
 0x194   : > { %3503 = vmatmul.mubr.msk.bf16.vlgmr.msra.gmra.mrb[32].mxu1 %vm430_vm5, %v4267_v22  ;;  %vm3095_vm5 = vcmask 1040384  }
 0x195   : > { %3525 = vmatprep.mubr.msk.f32.mxu1 %vm3849_vm2, %v3848_v19 }
 0x1e7   : > { %v4400_v53 = vpop.f32.mrb[0].mxu0 }
 0x1e8   : > { %v575_v5 = vrot.slane %v4400_v53, 6  ;;  %v3402_v24 = vpop.f32.mrb[1].mxu0 }
 0x1e9   : > { %v474_v25 = vpop.f32.mrb[2].mxu0 }
 0x1ea   : > { %576 = vrot.lane.b32.xlu0 %v575_v5, %s3853_s9  ;;  %v3403_v26 = vpop.f32.mrb[3].mxu0 }
 0x1eb   : > { %v4404_v27 = vpop.f32.mrb[0].mxu1 }
 0x1ec   : > { %v582_v28 = vrot.slane %v4404_v27, 2  ;;  %v3408_v6 = vpop.f32.mrb[1].mxu1 }
 0x1ed   : > { %v571_v30 = vpop.f32.mrb[2].mxu1 }
 0x1ee   : > { %583 = vrot.lane.b32.xlu0 %v582_v28, %s3853_s9  ;;  %v3409_v22 = vpop.f32.mrb[3].mxu1 }
 0x1ef   : > { %v4408_v7 = vpop.f32.mrb[4].mxu0 }
 0x1f0   : > { %v733_v12 = vrot.slane %v4408_v7, 6  ;;  %v3414_v31 = vpop.f32.mrb[5].mxu0 }
 0x1f1   : > { %v652_v32 = vpop.f32.mrb[6].mxu0 }
 0x1f2   : > { %734 = vrot.lane.b32.xlu1 %v733_v12, %s3853_s9  ;;  %v3415_v33 = vpop.f32.mrb[7].mxu0 }
 0x1f3   : > { %v4412_v34 = vpop.f32.mrb[4].mxu1 }
 0x1f4   : > { %v740_v37 = vrot.slane %v4412_v34, 2  ;;  %v3420_v39 = vpop.f32.mrb[5].mxu1 }
 0x1f5   : > { %v729_v40 = vpop.f32.mrb[6].mxu1 }
 0x1f6   : > { %741 = vrot.lane.b32.xlu1 %v740_v37, %s3853_s9  ;;  %v3421_v41 = vpop.f32.mrb[7].mxu1 }
 0x1f7   : > { %v4416_v8 = vpop.f32.mrb[8].mxu0 }
 0x1f8   : > { %v884_v42 = vrot.slane %v4416_v8, 6  ;;  %v3426_v44 = vpop.f32.mrb[9].mxu0 }
 0x1f9   : > { %v804_v29 = vpop.f32.mrb[10].mxu0 }
 0x1fa   : > { %885 = vrot.lane.b32.xlu0 %v884_v42, %s3853_s9  ;;  %v3427_v46 = vpop.f32.mrb[11].mxu0  ;;  %v580_v29 = vrot.slane %v4404_v27, 4 }
 0x1fb   : > { %v4420_v16 = vpop.f32.mrb[8].mxu1 }
 0x1fc   : > { %v891_v23 = vrot.slane %v4420_v16, 2  ;;  %v3432_v50 = vpop.f32.mrb[9].mxu1 }
 0x1fd   : > { %v880_v52 = vpop.f32.mrb[10].mxu1 }
 0x1fe   : > { %892 = vrot.lane.b32.xlu1 %v891_v23, %s3853_s9  ;;  %v3433_v17 = vpop.f32.mrb[11].mxu1  ;;  %v4468_v52 = vpop.permute.xlu1 %591 }
 0x1ff   : > { %v4424_v36 = vpop.f32.mrb[12].mxu0 }
 0x200   : > { %v1030_v38 = vrot.slane %v4424_v36, 6  ;;  %v3438_v54 = vpop.f32.mrb[13].mxu0 }
 0x201   : > { %v955_v55 = vpop.f32.mrb[14].mxu0 }
 0x202   : > { %1031 = vrot.lane.b32.xlu0 %v1030_v38, %s3853_s9  ;;  %v3439_v56 = vpop.f32.mrb[15].mxu0  ;;  %v738_v55 = vrot.slane %v4412_v34, 4 }
 0x203   : > { %v4428_v47 = vpop.f32.mrb[12].mxu1 }
 0x204   : > { %v1037_v35 = vrot.slane %v4428_v47, 2  ;;  %v3444_v58 = vpop.f32.mrb[13].mxu1 }
 0x205   : > { %v1026_v48 = vpop.f32.mrb[14].mxu1 }
 0x206   : > { %1038 = vrot.lane.b32.xlu1 %v1037_v35, %s3853_s9  ;;  %v3445_v51 = vpop.f32.mrb[15].mxu1 }
 0x207   : > { %v4432_v59 = vpop.f32.mrb[16].mxu0 }
 0x208   : > { %v1176_v49 = vrot.slane %v4432_v59, 6  ;;  %v3450_v60 = vpop.f32.mrb[17].mxu0 }
 0x209   : > { %v1101_v62 = vpop.f32.mrb[18].mxu0 }
 0x20a   : > { %1177 = vrot.lane.b32.xlu0 %v1176_v49, %s3853_s9  ;;  %v3451_v45 = vpop.f32.mrb[19].mxu0  ;;  %v3854_v62 = vmov 0.0|0.0  }
 0x20b   : > { %v4436_v63 = vpop.f32.mrb[16].mxu1  ;;  %3594 = vmatprep.subr.bf16.mxu0 %v3854_v62  ;;  %3600 = vmatprep.subr.bf16.mxu1 %v3854_v62 }
 0x20c   : > { %v1183_v1 = vrot.slane %v4436_v63, 2  ;;  %v3456_v2 = vpop.f32.mrb[17].mxu1 }
 0x20d   : > { %v1172_v43 = vpop.f32.mrb[18].mxu1 }
 0x20e   : > { %1184 = vrot.lane.b32.xlu1 %v1183_v1, %s3853_s9  ;;  %v3457_v3 = vpop.f32.mrb[19].mxu1 }
 0x20f   : > { %v4440_v61 = vpop.f32.mrb[20].mxu0 }
 0x210   : > { %v1322_v9 = vrot.slane %v4440_v61, 6  ;;  %v3462_v0 = vpop.f32.mrb[21].mxu0 }
 0x211   : > { %v1247_v10 = vpop.f32.mrb[22].mxu0  ;;  %v889_v0 = vrot.slane %v4420_v16, 4 }
 0x212   : > { %1323 = vrot.lane.b32.xlu0 %v1322_v9, %s3853_s9  ;;  %v3463_v11 = vpop.f32.mrb[23].mxu0 }
 0x213   : > { %v4444_v57 = vpop.f32.mrb[20].mxu1 }
 0x214   : > { %v1329_v13 = vrot.slane %v4444_v57, 2  ;;  %v3468_v14 = vpop.f32.mrb[21].mxu1 }
 0x215   : > { %v1318_v15 = vpop.f32.mrb[22].mxu1 }
 0x216   : > { %1330 = vrot.lane.b32.xlu1 %v1329_v13, %s3853_s9  ;;  %v3469_v18 = vpop.f32.mrb[23].mxu1 }
 0x217   : > { %v4448_v20 = vpop.f32.mrb[24].mxu0 }
 0x218   : > { %v1468_v21 = vrot.slane %v4448_v20, 6  ;;  %v3474_v5 = vpop.f32.mrb[25].mxu0 }
 0x219   : > { %v1393_v24 = vpop.f32.mrb[26].mxu0 }
 0x21a   : > { %1469 = vrot.lane.b32.xlu0 %v1468_v21, %s3853_s9  ;;  %v3475_v25 = vpop.f32.mrb[27].mxu0 }
 0x21b   : > { %v4452_v26 = vpop.f32.mrb[24].mxu1  ;;  %v1035_v25 = vrot.slane %v4428_v47, 4  ;;  %v1181_v47 = vrot.slane %v4436_v63, 4  ;;  %v1327_v63 = vrot.slane %v4444_v57, 4 }
 0x21c   : > { %v1475_v28 = vrot.slane %v4452_v26, 2  ;;  %v3480_v6 = vpop.f32.mrb[25].mxu1  ;;  %v1473_v57 = vrot.slane %v4452_v26, 4 }
 0x21d   : > { %v1464_v30 = vpop.f32.mrb[26].mxu1 }
 0x21e   : > { %1476 = vrot.lane.b32.xlu1 %v1475_v28, %s3853_s9  ;;  %v3481_v22 = vpop.f32.mrb[27].mxu1 }
 0x21f   : > { %v4456_v12 = vpop.f32.mrb[28].mxu0 }
 0x220   : > { %v1614_v31 = vrot.slane %v4456_v12, 6  ;;  %v3486_v32 = vpop.f32.mrb[29].mxu0 }
 0x221   : > { %v1539_v33 = vpop.f32.mrb[30].mxu0 }
 0x222   : > { %1615 = vrot.lane.b32.xlu0 %v1614_v31, %s3853_s9  ;;  %v3487_v37 = vpop.f32.mrb[31].mxu0 }
 0x223   : > { %v4460_v39 = vpop.f32.mrb[28].mxu1 }
 0x224   : > { %v1621_v40 = vrot.slane %v4460_v39, 2  ;;  %v3492_v41 = vpop.f32.mrb[29].mxu1  ;;  %v1619_v26 = vrot.slane %v4460_v39, 4 }
 0x225   : > { %v1610_v42 = vpop.f32.mrb[30].mxu1 }
 0x226   : > { %1622 = vrot.lane.b32.xlu1 %v1621_v40, %s3853_s9  ;;  %v3493_v44 = vpop.f32.mrb[31].mxu1 }
 0x25c   : > { %v577_v46 = vpop.permute.xlu0 %576 }
 0x25d   : > { %v586_v23 = vsel %vm391_vm0, %v4400_v53, %v577_v46 }
 0x25e   : > { %v587_v50 = vsel %vm395_vm1, %v586_v23, %v580_v29 }
 0x260   : > { %v584_v17 = vpop.permute.xlu0 %583 }
 0x261   : > { %v588_v38 = vsel %vm434_vm4, %v587_v50, %v584_v17 }
 0x262   : > { %v594_v49 = vadd.f32 %v4468_v52, %v588_v38 }
 0x263   : > { %v4471_v54 = vpop.f32.mrb[32].mxu0 }
 0x264   : > { %v1760_v56 = vrot.slane %v4471_v54, 6  ;;  %v735_v35 = vpop.permute.xlu1 %734  ;;  %v3498_v58 = vpop.f32.mrb[33].mxu0  ;;  %v596_v9 = vmul.f32 0.01, %v594_v49  ;;  %vm595_vm6 = vcmp.ge.f32.partialorder %v594_v49, 0.0 }
 0x265   : > { %v744_v27 = vsel %vm391_vm0, %v4408_v7, %v735_v35  ;;  %v1685_v48 = vpop.f32.mrb[34].mxu0 }
 0x266   : > { %1761 = vrot.lane.b32.xlu0 %v1760_v56, %s3853_s9  ;;  %v745_v53 = vsel %vm395_vm1, %v744_v27, %v738_v55  ;;  %v3499_v51 = vpop.f32.mrb[35].mxu0  ;;  %v4492_v15 = vsel %vm595_vm6, %v594_v49, %v596_v9 }
 0x267   : > { %v4480_v60 = vpop.f32.mrb[32].mxu1 }
 0x268   : > { %v1767_v34 = vrot.slane %v4480_v60, 2  ;;  %v742_v45 = vpop.permute.xlu1 %741  ;;  %v3504_v1 = vpop.f32.mrb[33].mxu1 }
 0x269   : > { %v746_v7 = vsel %vm434_vm4, %v745_v53, %v742_v45  ;;  %v1756_v2 = vpop.f32.mrb[34].mxu1 }
 0x26a   : > { %v747_v43 = vadd.f32 %v746_v7, %v4468_v52  ;;  %1768 = vrot.lane.b32.xlu1 %v1767_v34, %s3853_s9  ;;  %v3505_v3 = vpop.f32.mrb[35].mxu1 }
 0x26c   : > { %v749_v10 = vmul.f32 0.01, %v747_v43  ;;  %v886_v11 = vpop.permute.xlu0 %885  ;;  %vm748_vm7 = vcmp.ge.f32.partialorder %v747_v43, 0.0 }
 0x26d   : > { %v895_v13 = vsel %vm391_vm0, %v4416_v8, %v886_v11 }
 0x26e   : > { %v896_v14 = vsel %vm395_vm1, %v895_v13, %v889_v0  ;;  %v4494_v18 = vsel %vm748_vm7, %v747_v43, %v749_v10 }
 0x26f   : > { %v3730_v21 = vpack.i.bf16 %v4494_v18, %v4492_v15 }
 0x270   : > { %v893_v5 = vpop.permute.xlu1 %892 }
 0x271   : > { %v897_v24 = vsel %vm434_vm4, %v896_v14, %v893_v5  ;;  %3731 = vrot.lane.b32.xlu0 %v3730_v21, %s3845_s22  ;;  %v369_v14 = vld [vmem:[%s4871_s6] sm:$0xff] }
 0x272   : > { %v898_v16 = vadd.f32 %v897_v24, %v4468_v52 }
 0x274   : > { %v1032_v28 = vpop.permute.xlu0 %1031  ;;  %vm899_vm8 = vcmp.ge.f32.partialorder %v898_v16, 0.0  ;;  %v900_v8 = vmul.f32 0.01, %v898_v16 }
 0x275   : > { %v1041_v6 = vsel %vm391_vm0, %v4424_v36, %v1032_v28 }
 0x276   : > { %v4504_v30 = vsel %vm899_vm8, %v898_v16, %v900_v8  ;;  %v1042_v22 = vsel %vm395_vm1, %v1041_v6, %v1035_v25  ;;  %vm3112_vm8 = vcmask 1042432  }
 0x277   : > { %1869 = vrot.lane.b32.xlu1 %v4504_v30, %s3845_s22 }
 0x278   : > { %v1039_v31 = vpop.permute.xlu1 %1038 }
 0x279   : > { %v1043_v32 = vsel %vm434_vm4, %v1042_v22, %v1039_v31  ;;  %v367_v31 = vld [vmem:[%s4870_s5] sm:$0xff] }
 0x27a   : > { %v1044_v33 = vadd.f32 %v1043_v32, %v4468_v52 }
 0x27c   : > { %v1178_v37 = vpop.permute.xlu0 %1177  ;;  %vm1045_vm9 = vcmp.ge.f32.partialorder %v1044_v33, 0.0  ;;  %v1046_v40 = vmul.f32 0.01, %v1044_v33 }
 0x27d   : > { %v1187_v36 = vsel %vm391_vm0, %v4432_v59, %v1178_v37 }
 0x27e   : > { %v4514_v41 = vsel %vm1045_vm9, %v1044_v33, %v1046_v40  ;;  %v1188_v42 = vsel %vm395_vm1, %v1187_v36, %v1181_v47 }
 0x27f   : > { %1946 = vrot.lane.b32.xlu0 %v4514_v41, %s3845_s22 }
 0x280   : > { %v1185_v44 = vpop.permute.xlu1 %1184 }
 0x281   : > { %v1189_v29 = vsel %vm434_vm4, %v1188_v42, %v1185_v44 }
 0x282   : > { %v1190_v46 = vadd.f32 %v1189_v29, %v4468_v52  ;;  %v3855_v29 = vmov 1966171168  }
 0x284   : > { %v1324_v23 = vpop.permute.xlu0 %1323  ;;  %vm1191_vm10 = vcmp.ge.f32.partialorder %v1190_v46, 0.0  ;;  %v1192_v50 = vmul.f32 0.01, %v1190_v46 }
 0x285   : > { %v1333_v59 = vsel %vm391_vm0, %v4440_v61, %v1324_v23 }
 0x286   : > { %v4524_v17 = vsel %vm1191_vm10, %v1190_v46, %v1192_v50  ;;  %v1334_v38 = vsel %vm395_vm1, %v1333_v59, %v1327_v63  ;;  %v2410_v46 = vunpack.c.l.s4 %v3855_v29  ;;  %vm3129_vm10 = vcmask 1044480  }
 0x287   : > { %2023 = vrot.lane.b32.xlu1 %v4524_v17, %s3845_s22 }
 0x288   : > { %v1331_v55 = vpop.permute.xlu1 %1330  ;;  %v2411_v63 = vunpack.c.0.s8 %v2410_v46 }
 0x289   : > { %v1335_v56 = vsel %vm434_vm4, %v1334_v38, %v1331_v55 }
 0x28a   : > { %v1336_v35 = vadd.f32 %v1335_v56, %v4468_v52  ;;  %v4619_v55 = vsub.s32 %v2411_v63, %v3974_v4 }
 0x28c   : > { %v1470_v58 = vpop.permute.xlu0 %1469  ;;  %vm1337_vm11 = vcmp.ge.f32.partialorder %v1336_v35, 0.0  ;;  %v1338_v27 = vmul.f32 0.01, %v1336_v35 }
 0x28d   : > { %v1479_v61 = vsel %vm391_vm0, %v4448_v20, %v1470_v58 }
 0x28e   : > { %v4534_v48 = vsel %vm1337_vm11, %v1336_v35, %v1338_v27  ;;  %v1480_v53 = vsel %vm395_vm1, %v1479_v61, %v1473_v57 }
 0x28f   : > { %2100 = vrot.lane.b32.xlu0 %v4534_v48, %s3845_s22 }
 0x290   : > { %v1477_v51 = vpop.permute.xlu1 %1476 }
 0x291   : > { %v1481_v49 = vsel %vm434_vm4, %v1480_v53, %v1477_v51  ;;  %v4624_v51 = vsub.s32 0, %v3974_v4 }
 0x292   : > { %v1482_v34 = vadd.f32 %v1481_v49, %v4468_v52 }
 0x294   : > { %v1616_v45 = vpop.permute.xlu0 %1615  ;;  %vm1483_vm12 = vcmp.ge.f32.partialorder %v1482_v34, 0.0  ;;  %v1484_v1 = vmul.f32 0.01, %v1482_v34 }
 0x295   : > { %v1625_v20 = vsel %vm391_vm0, %v4456_v12, %v1616_v45  ;;  %v1765_v12 = vrot.slane %v4480_v60, 4 }
 0x296   : > { %v4544_v7 = vsel %vm1483_vm12, %v1482_v34, %v1484_v1  ;;  %v1626_v2 = vsel %vm395_vm1, %v1625_v20, %v1619_v26  ;;  %vm3155_vm12 = vcmask 130048  }
 0x297   : > { %2177 = vrot.lane.b32.xlu1 %v4544_v7, %s3845_s22 }
 0x298   : > { %v1623_v43 = vpop.permute.xlu1 %1622 }
 0x299   : > { %v1627_v3 = vsel %vm434_vm4, %v1626_v2, %v1623_v43 }
 0x29a   : > { %v1628_v9 = vadd.f32 %v1627_v3, %v4468_v52 }
 0x29c   : > { %vm1629_vm13 = vcmp.ge.f32.partialorder %v1628_v9, 0.0  ;;  %v1630_v39 = vmul.f32 0.01, %v1628_v9 }
 0x29e   : > { %v4551_v0 = vsel %vm1629_vm13, %v1628_v9, %v1630_v39 }
 0x29f   : > { %2254 = vrot.lane.b32.xlu0 %v4551_v0, %s3845_s22 }
 0x2a3   : > { %1788 = vperm.xlu0 %3735, %v369_v14  }
 0x2d8   : > { %v1762_v10 = vpop.permute.xlu0 %1761 }
 0x2d9   : > { %v1771_v11 = vsel %vm391_vm0, %v4471_v54, %v1762_v10 }
 0x2da   : > { %v1772_v13 = vsel %vm395_vm1, %v1771_v11, %v1765_v12 }
 0x2dc   : > { %v1769_v21 = vpop.permute.xlu1 %1768 }
 0x2dd   : > { %v1773_v5 = vsel %vm434_vm4, %v1772_v13, %v1769_v21 }
 0x2de   : > { %v1774_v24 = vadd.f32 %v1773_v5, %v4468_v52 }
 0x2e0   : > { %vm1775_vm14 = vcmp.ge.f32.partialorder %v1774_v24, 0.0  ;;  %v1776_v16 = vmul.f32 0.01, %v1774_v24 }
 0x2e2   : > { %v4564_v25 = vsel %vm1775_vm14, %v1774_v24, %v1776_v16 }
 0x2e3   : > { %v3732_v60 = vpop.permute.xlu0 %3731  ;;  %2331 = vrot.lane.b32.xlu1 %v4564_v25, %s3845_s22  ;;  %s325_s22 = sand.u32 1, %s3818_s25  }
 0x2e4   : > { %v3734_v54 = vunpack.i.h.bf16 %v3732_v60  ;;  %v3733_v28 = vunpack.i.l.bf16 %v3732_v60  ;;  %s3283_s13 = sshll.u32 %s325_s22, 6  ;;  %s4813_s20 = scalar_lea.sflag [#allocation3], %s325_s22 }
 0x2e5   : > { %s327_s27 = scalar_lea.vmem [#allocation2], %s3283_s13  ;;  %s3752_s13 = sshll.u32 %s3856_s10, 4  ;;  %s3753_s13 = int_to_ptr.vmem [resolvable:$false] %s3752_s13 }
 0x2e6   : > { %v3598_v8 = vpack.c.bf16 %v3734_v54, %v4494_v18  ;;  %v3595_v6 = vpack.c.bf16 %v3733_v28, %v4492_v15  ;;  %s3179_s23 = sshll.u32 %s327_s27, 4  ;;  %s3754_s16 = scalar_lea.vmem %s3753_s13, 2048  ;;  %s4804_s23 = int_to_ptr.vmem [resolvable:$true] %s3179_s23 }
 0x2e7   : > { %s3748_s21 = scalar_lea.vmem %s4804_s23, 1024  ;;  %p3755_p5 = scmp.lt.s32.totalorder %s4804_s23, %s3753_s13 }
 0x2e8   : > { %3596 = vmatpush3.bf16.msra.mxu0 %v3595_v6  ;;  %3602 = vmatpush3.bf16.msra.mxu1 %v3598_v8  ;;  %p3749_p1 = scmp.ne.s32.totalorder %s4804_s23, %s3748_s21  ;;  %p3756_p6 = scmp.lt.s32.totalorder %s3754_s16, %s3748_s21 }
 0x2e9   : > { %v1870_v22 = vpop.permute.xlu1 %1869  ;;  %3597 = vmatprep.subr.bf16.mxu0 %v3854_v62  ;;  %3603 = vmatprep.subr.bf16.mxu1 %v3854_v62 }
 0x2ea   : > { %v3604_v52 = vpack.c.bf16 %v1870_v22, %v4504_v30  ;;  %p3750_p2 = pnand %p3749_p1, %p3951_p3  ;;  %p3757_p7 = por %p3756_p6, %p3755_p5 }
 0x2ec   : > { %3599 = vmatpush3.bf16.msra.mxu0 %v3598_v8  ;;  %3605 = vmatpush3.bf16.msra.mxu1 %v3604_v52  ;;  %p3751_p4 = pneg %p3750_p2 }
 0x2ed   : > { %3606 = vmatprep.subr.bf16.mxu0 %v3854_v62  ;;  %3612 = vmatprep.subr.bf16.mxu1 %v3854_v62 }
 0x2ee   : > { %p3758_p9 = pnand %p3757_p7, %p3751_p4 }
 0x2ef   : > { %3515 = vmatmul.mubr.msk.f32.vlgmr.msra.gmra.mrb[36].mxu0 %vm1791_vm15, %v367_v31  ;;  %3526 = vmatmul.mubr.msk.f32.vlgmr.msra.gmra.mrb[36].mxu1 %vm1791_vm15, %v367_v31 }
 0x2f0   : > { %3608 = vmatpush3.bf16.msra.mxu0 %v3604_v52  ;;  %3536 = vmatprep.mubr.msk.f32.mxu0 %vm3849_vm2, %v3848_v19 }
 0x2f1   : > { %v1947_v15 = vpop.permute.xlu0 %1946  ;;  %3609 = vmatprep.subr.bf16.mxu0 %v3854_v62  ;;  %3547 = vmatprep.mubr.msk.f32.mxu1 %vm3849_vm2, %v3848_v19 }
 0x2f2   : > { %v3610_v18 = vpack.c.bf16 %v1947_v15, %v4514_v41 }
 0x2f4   : > { %3611 = vmatpush3.bf16.msra.mxu0 %v3610_v18  ;;  %3614 = vmatpush3.bf16.msra.mxu1 %v3610_v18 }
 0x2f5   : > { %3615 = vmatprep.subr.bf16.mxu1 %v3854_v62  ;;  %3618 = vmatprep.subr.bf16.mxu0 %v3854_v62 }
 0x2f7   : > { %3537 = vmatmul.mubr.msk.f32.vlgmr.msra.gmra.mrb[38].mxu0 %vm1791_vm15, %v367_v31 }
 0x2f8   : > { %3558 = vmatprep.mubr.msk.f32.mxu0 %vm3849_vm2, %v3848_v19 }
 0x2f9   : > { %v2024_v30 = vpop.permute.xlu1 %2023 }
 0x2fa   : > { %v3616_v32 = vpack.c.bf16 %v2024_v30, %v4524_v17 }
 0x2fc   : > { %3617 = vmatpush3.bf16.msra.mxu1 %v3616_v32  ;;  %3620 = vmatpush3.bf16.msra.mxu0 %v3616_v32 }
 0x2fd   : > { %3621 = vmatprep.subr.bf16.mxu0 %v3854_v62  ;;  %3624 = vmatprep.subr.bf16.mxu1 %v3854_v62 }
 0x2ff   : > { %3548 = vmatmul.mubr.msk.f32.vlgmr.msra.gmra.mrb[38].mxu1 %vm1791_vm15, %v367_v31 }
 0x300   : > { %3569 = vmatprep.mubr.msk.f32.mxu1 %vm3849_vm2, %v3848_v19 }
 0x301   : > { %v2101_v33 = vpop.permute.xlu0 %2100 }
 0x302   : > { %v3622_v47 = vpack.c.bf16 %v2101_v33, %v4534_v48 }
 0x304   : > { %3623 = vmatpush3.bf16.msra.mxu0 %v3622_v47  ;;  %3626 = vmatpush3.bf16.msra.mxu1 %v3622_v47 }
 0x305   : > { %3627 = vmatprep.subr.bf16.mxu1 %v3854_v62  ;;  %3630 = vmatprep.subr.bf16.mxu0 %v3854_v62 }
 0x307   : > { %3559 = vmatmul.mubr.msk.f32.vlgmr.msra.gmra.mrb[40].mxu0 %vm1791_vm15, %v367_v31 }
 0x308   : > { %3580 = vmatprep.mubr.msk.f32.mxu0 %vm3849_vm2, %v3848_v19 }
 0x309   : > { %v2178_v37 = vpop.permute.xlu1 %2177 }
 0x30a   : > { %v3628_v40 = vpack.c.bf16 %v2178_v37, %v4544_v7 }
 0x30c   : > { %3629 = vmatpush3.bf16.msra.mxu1 %v3628_v40  ;;  %3632 = vmatpush3.bf16.msra.mxu0 %v3628_v40 }
 0x30d   : > { %3633 = vmatprep.subr.bf16.mxu0 %v3854_v62  ;;  %3636 = vmatprep.subr.bf16.mxu1 %v3854_v62 }
 0x30f   : > { %3570 = vmatmul.mubr.msk.f32.vlgmr.msra.gmra.mrb[40].mxu1 %vm1791_vm15, %v367_v31 }
 0x310   : > { %3591 = vmatprep.mubr.msk.f32.mxu1 %vm3849_vm2, %v3848_v19 }
 0x311   : > { %v2255_v36 = vpop.permute.xlu0 %2254 }
 0x312   : > { %v3634_v41 = vpack.c.bf16 %v2255_v36, %v4551_v0 }
 0x314   : > { %3635 = vmatpush3.bf16.msra.mxu0 %v3634_v41  ;;  %3638 = vmatpush3.bf16.msra.mxu1 %v3634_v41 }
 0x315   : > { %3639 = vmatprep.subr.bf16.mxu1 %v3854_v62 }
 0x317   : > { %3581 = vmatmul.mubr.msk.f32.vlgmr.msra.gmra.mrb[42].mxu0 %vm1791_vm15, %v367_v31 }
 0x322   : > { %v4614_v23 = vpop.permute.xlu0 %1788 }
 0x355   : > { %v2332_v42 = vpop.permute.xlu1 %2331 }
 0x356   : > { %v3640_v44 = vpack.c.bf16 %v2332_v42, %v4564_v25 }
 0x358   : > { %3641 = vmatpush3.bf16.msra.mxu1 %v3640_v44 }
 0x35b   : > { %3592 = vmatmul.mubr.msk.f32.vlgmr.msra.gmra.mrb[42].mxu1 %vm1791_vm15, %v367_v31 }
 0x3c2   : > { %v1861_v19 = vpop.f32.mrb[36].mxu0  ;;  %v1938_v50 = vpop.f32.mrb[36].mxu1 }
 0x3c3   : > { %v3516_v59 = vpop.f32.mrb[37].mxu0  ;;  %v1862_v17 = vadd.f32 %v1861_v19, %v4614_v23  ;;  %v1939_v62 = vadd.f32 %v1938_v50, %v4614_v23  ;;  %v3527_v38 = vpop.f32.mrb[37].mxu1 }
 0x3c5   : > { %vm1865_vm2 = vcmp.ge.f32.partialorder %v1862_v17, 0.0  ;;  %v1866_v56 = vmul.f32 0.01, %v1862_v17  ;;  %vm1942_vm3 = vcmp.ge.f32.partialorder %v1939_v62, 0.0  ;;  %v1943_v35 = vmul.f32 0.01, %v1939_v62 }
 0x3c7   : > { %v1867_v57 = vsel %vm1865_vm2, %v1862_v17, %v1866_v56  ;;  %v1944_v58 = vsel %vm1942_vm3, %v1939_v62, %v1943_v35 }
 0x3c8   : > { %v2408_v27 = vcombine.high %v1867_v57, %v1867_v57  ;;  %v2415_v61 = vrot.slane %v1867_v57, %v4619_v55  ;;  %v2466_v48 = vcombine.high %v1944_v58, %v1944_v58  ;;  %v2473_v53 = vrot.slane %v1944_v58, %v4619_v55 }
 0x3ca   : > { %v2422_v49 = vrot.slane %v2408_v27, %v4619_v55  ;;  %v2423_v34 = vcombine.high %v2415_v61, %v2415_v61  ;;  %v2431_v26 = vrot.slane %v2415_v61, %v4619_v55  ;;  %v2480_v45 = vrot.slane %v2466_v48, %v4619_v55  ;;  %v2015_v1 = vpop.f32.mrb[38].mxu0 }
 0x3cb   : > { %v2481_v20 = vcombine.high %v2473_v53, %v2473_v53  ;;  %v2489_v7 = vrot.slane %v2473_v53, %v4619_v55  ;;  %v2016_v2 = vadd.f32 %v2015_v1, %v4614_v23  ;;  %v3538_v43 = vpop.f32.mrb[39].mxu0 }
 0x3cc   : > { %v2424_v3 = vcombine.high %v2422_v49, %v2422_v49  ;;  %v2438_v9 = vrot.slane %v2422_v49, %v4619_v55  ;;  %v2445_v4 = vrot.slane %v2423_v34, %v4619_v55  ;;  %v2453_v39 = vcombine.high %v2431_v26, %v2431_v26 }
 0x3cd   : > { %v2482_v0 = vcombine.high %v2480_v45, %v2480_v45  ;;  %v2496_v12 = vrot.slane %v2480_v45, %v4619_v55  ;;  %v2503_v10 = vrot.slane %v2481_v20, %v4619_v55  ;;  %v2511_v11 = vcombine.high %v2489_v7, %v2489_v7 }
 0x3ce   : > { %v2452_v13 = vrot.slane %v2424_v3, %v4619_v55  ;;  %v2454_v14 = vcombine.high %v2438_v9, %v2438_v9  ;;  %v2455_v21 = vcombine.high %v2445_v4, %v2445_v4  ;;  %v2818_v5 = vrot.slane %v2489_v7, %v4624_v51 }
 0x3cf   : > { %v2510_v24 = vrot.slane %v2482_v0, %v4619_v55  ;;  %v2512_v16 = vcombine.high %v2496_v12, %v2496_v12  ;;  %v2513_v25 = vcombine.high %v2503_v10, %v2503_v10  ;;  %v2822_v60 = vrot.slane %v2503_v10, %v4624_v51 }
 0x3d0   : > { %v2456_v54 = vcombine.high %v2452_v13, %v2452_v13  ;;  %v2826_v28 = vrot.slane %v2511_v11, %v4624_v51  ;;  %v2834_v8 = vrot.slane %v2496_v12, %v4624_v51  ;;  %v3096_v6 = vsel %vm3095_vm5, %v2431_v26, %v2818_v5 }
 0x3d1   : > { %v2514_v22 = vcombine.high %v2510_v24, %v2510_v24  ;;  %v2830_v52 = vrot.slane %v2513_v25, %v4624_v51  ;;  %v2838_v31 = vrot.slane %v2510_v24, %v4624_v51  ;;  %v2842_v15 = vrot.slane %v2512_v16, %v4624_v51 }
 0x3d2   : > { %v3097_v18 = vsel %vm3095_vm5, %v2445_v4, %v2822_v60  ;;  %v3098_v30 = vsel %vm3095_vm5, %v2453_v39, %v2826_v28  ;;  %v3100_v32 = vsel %vm3095_vm5, %v2438_v9, %v2834_v8  ;;  %vm2019_vm6 = vcmp.ge.f32.partialorder %v2016_v2, 0.0  ;;  %v2092_v33 = vpop.f32.mrb[38].mxu1 }
 0x3d3   : > { %v2846_v47 = vrot.slane %v2514_v22, %v4624_v51  ;;  %v3099_v37 = vsel %vm3095_vm5, %v2455_v21, %v2830_v52  ;;  %v3101_v40 = vsel %vm3095_vm5, %v2452_v13, %v2838_v31  ;;  %v3102_v36 = vsel %vm3095_vm5, %v2454_v14, %v2842_v15  ;;  %v3549_v41 = vpop.f32.mrb[39].mxu1 }
 0x3d4   : > { %v2020_v42 = vmul.f32 0.01, %v2016_v2  ;;  %v2093_v44 = vadd.f32 %v2092_v33, %v4614_v23 }
 0x3d5   : > { %v3103_v29 = vsel %vm3095_vm5, %v2456_v54, %v2846_v47 }
 0x3d6   : > { %v2021_v46 = vsel %vm2019_vm6, %v2016_v2, %v2020_v42  ;;  %vm2096_vm7 = vcmp.ge.f32.partialorder %v2093_v44, 0.0  ;;  %v2097_v63 = vmul.f32 0.01, %v2093_v44 }
 0x3d7   : > { %v2516_v19 = vcombine.high %v2021_v46, %v2021_v46  ;;  %v2523_v50 = vrot.slane %v2021_v46, %v4619_v55 }
 0x3d8   : > { %v2098_v59 = vsel %vm2096_vm7, %v2093_v44, %v2097_v63 }
 0x3d9   : > { %v2530_v17 = vrot.slane %v2516_v19, %v4619_v55  ;;  %v2531_v62 = vcombine.high %v2523_v50, %v2523_v50  ;;  %v2539_v38 = vrot.slane %v2523_v50, %v4619_v55  ;;  %v2566_v56 = vcombine.high %v2098_v59, %v2098_v59 }
 0x3da   : > { %v2573_v35 = vrot.slane %v2098_v59, %v4619_v55  ;;  %v2169_v57 = vpop.f32.mrb[40].mxu0 }
 0x3db   : > { %v2532_v58 = vcombine.high %v2530_v17, %v2530_v17  ;;  %v2546_v27 = vrot.slane %v2530_v17, %v4619_v55  ;;  %v2553_v61 = vrot.slane %v2531_v62, %v4619_v55  ;;  %v2561_v48 = vcombine.high %v2539_v38, %v2539_v38  ;;  %v3560_v53 = vpop.f32.mrb[41].mxu0 }
 0x3dc   : > { %v2858_v49 = vrot.slane %v2539_v38, %v4624_v51  ;;  %v2580_v34 = vrot.slane %v2566_v56, %v4619_v55  ;;  %v2581_v26 = vcombine.high %v2573_v35, %v2573_v35  ;;  %v2589_v45 = vrot.slane %v2573_v35, %v4619_v55 }
 0x3dd   : > { %v2560_v1 = vrot.slane %v2532_v58, %v4619_v55  ;;  %v2562_v20 = vcombine.high %v2546_v27, %v2546_v27  ;;  %v2563_v7 = vcombine.high %v2553_v61, %v2553_v61  ;;  %v2862_v2 = vrot.slane %v2553_v61, %v4624_v51 }
 0x3de   : > { %v2866_v43 = vrot.slane %v2561_v48, %v4624_v51  ;;  %v2874_v3 = vrot.slane %v2546_v27, %v4624_v51  ;;  %v3104_v9 = vsel %vm391_vm0, %v3096_v6, %v2858_v49  ;;  %v2582_v4 = vcombine.high %v2580_v34, %v2580_v34 }
 0x3df   : > { %v2564_v39 = vcombine.high %v2560_v1, %v2560_v1  ;;  %v2870_v0 = vrot.slane %v2563_v7, %v4624_v51  ;;  %v2878_v12 = vrot.slane %v2560_v1, %v4624_v51  ;;  %v2882_v10 = vrot.slane %v2562_v20, %v4624_v51 }
 0x3e0   : > { %v3105_v11 = vsel %vm391_vm0, %v3097_v18, %v2862_v2  ;;  %v3106_v13 = vsel %vm391_vm0, %v3098_v30, %v2866_v43  ;;  %v3108_v14 = vsel %vm391_vm0, %v3100_v32, %v2874_v3  ;;  %v2596_v21 = vrot.slane %v2580_v34, %v4619_v55 }
 0x3e1   : > { %v2886_v5 = vrot.slane %v2564_v39, %v4624_v51  ;;  %v3107_v24 = vsel %vm391_vm0, %v3099_v37, %v2870_v0  ;;  %v3109_v16 = vsel %vm391_vm0, %v3101_v40, %v2878_v12  ;;  %v3110_v25 = vsel %vm391_vm0, %v3102_v36, %v2882_v10 }
 0x3e2   : > { %v2603_v60 = vrot.slane %v2581_v26, %v4619_v55  ;;  %v2610_v54 = vrot.slane %v2582_v4, %v4619_v55  ;;  %v2611_v28 = vcombine.high %v2589_v45, %v2589_v45  ;;  %v2612_v8 = vcombine.high %v2596_v21, %v2596_v21  ;;  %v2246_v6 = vpop.f32.mrb[40].mxu1 }
 0x3e3   : > { %v3111_v22 = vsel %vm391_vm0, %v3103_v29, %v2886_v5  ;;  %v2898_v52 = vrot.slane %v2589_v45, %v4624_v51  ;;  %v2914_v31 = vrot.slane %v2596_v21, %v4624_v51  ;;  %v2170_v15 = vadd.f32 %v2169_v57, %v4614_v23  ;;  %v3571_v18 = vpop.f32.mrb[41].mxu1 }
 0x3e4   : > { %v2613_v30 = vcombine.high %v2603_v60, %v2603_v60  ;;  %v2614_v32 = vcombine.high %v2610_v54, %v2610_v54  ;;  %v2902_v33 = vrot.slane %v2603_v60, %v4624_v51  ;;  %v2906_v47 = vrot.slane %v2611_v28, %v4624_v51 }
 0x3e5   : > { %v2918_v37 = vrot.slane %v2610_v54, %v4624_v51  ;;  %v2922_v40 = vrot.slane %v2612_v8, %v4624_v51  ;;  %v3113_v36 = vsel %vm3112_vm8, %v3104_v9, %v2898_v52  ;;  %v3117_v41 = vsel %vm3112_vm8, %v3108_v14, %v2914_v31 }
 0x3e6   : > { %v2910_v42 = vrot.slane %v2613_v30, %v4624_v51  ;;  %v2926_v44 = vrot.slane %v2614_v32, %v4624_v51  ;;  %v3114_v29 = vsel %vm3112_vm8, %v3105_v11, %v2902_v33  ;;  %v3115_v46 = vsel %vm3112_vm8, %v3106_v13, %v2906_v47 }
 0x3e7   : > { %v3118_v63 = vsel %vm3112_vm8, %v3109_v16, %v2918_v37  ;;  %v3119_v19 = vsel %vm3112_vm8, %v3110_v25, %v2922_v40  ;;  %vm2173_vm0 = vcmp.ge.f32.partialorder %v2170_v15, 0.0  ;;  %v2174_v50 = vmul.f32 0.01, %v2170_v15 }
 0x3e8   : > { %v3116_v59 = vsel %vm3112_vm8, %v3107_v24, %v2910_v42  ;;  %v3120_v17 = vsel %vm3112_vm8, %v3111_v22, %v2926_v44  ;;  %v2247_v62 = vadd.f32 %v2246_v6, %v4614_v23 }
 0x3e9   : > { %v2175_v38 = vsel %vm2173_vm0, %v2170_v15, %v2174_v50 }
 0x3ea   : > { %v2616_v56 = vcombine.high %v2175_v38, %v2175_v38  ;;  %v2623_v35 = vrot.slane %v2175_v38, %v4619_v55  ;;  %vm2250_vm9 = vcmp.ge.f32.partialorder %v2247_v62, 0.0  ;;  %v2251_v57 = vmul.f32 0.01, %v2247_v62  ;;  %v2323_v58 = vpop.f32.mrb[42].mxu0 }
 0x3eb   : > { %v2324_v27 = vadd.f32 %v2323_v58, %v4614_v23  ;;  %v3582_v61 = vpop.f32.mrb[43].mxu0 }
 0x3ec   : > { %v2630_v48 = vrot.slane %v2616_v56, %v4619_v55  ;;  %v2631_v53 = vcombine.high %v2623_v35, %v2623_v35  ;;  %v2639_v49 = vrot.slane %v2623_v35, %v4619_v55  ;;  %v2252_v34 = vsel %vm2250_vm9, %v2247_v62, %v2251_v57 }
 0x3ed   : > { %v2666_v26 = vcombine.high %v2252_v34, %v2252_v34  ;;  %v2673_v45 = vrot.slane %v2252_v34, %v4619_v55  ;;  %vm2327_vm11 = vcmp.ge.f32.partialorder %v2324_v27, 0.0  ;;  %v2328_v1 = vmul.f32 0.01, %v2324_v27 }
 0x3ee   : > { %v2632_v20 = vcombine.high %v2630_v48, %v2630_v48  ;;  %v2646_v7 = vrot.slane %v2630_v48, %v4619_v55  ;;  %v2653_v2 = vrot.slane %v2631_v53, %v4619_v55  ;;  %v2661_v43 = vcombine.high %v2639_v49, %v2639_v49 }
 0x3ef   : > { %v2938_v3 = vrot.slane %v2639_v49, %v4624_v51  ;;  %v2680_v9 = vrot.slane %v2666_v26, %v4619_v55  ;;  %v2681_v4 = vcombine.high %v2673_v45, %v2673_v45  ;;  %v2689_v39 = vrot.slane %v2673_v45, %v4619_v55 }
 0x3f0   : > { %v2660_v0 = vrot.slane %v2632_v20, %v4619_v55  ;;  %v2662_v12 = vcombine.high %v2646_v7, %v2646_v7  ;;  %v2663_v10 = vcombine.high %v2653_v2, %v2653_v2  ;;  %v2942_v11 = vrot.slane %v2653_v2, %v4624_v51 }
 0x3f1   : > { %v2946_v13 = vrot.slane %v2661_v43, %v4624_v51  ;;  %v2954_v14 = vrot.slane %v2646_v7, %v4624_v51  ;;  %v3121_v21 = vsel %vm395_vm1, %v3113_v36, %v2938_v3  ;;  %v2682_v5 = vcombine.high %v2680_v9, %v2680_v9 }
 0x3f2   : > { %v2664_v24 = vcombine.high %v2660_v0, %v2660_v0  ;;  %v2950_v16 = vrot.slane %v2663_v10, %v4624_v51  ;;  %v2958_v25 = vrot.slane %v2660_v0, %v4624_v51  ;;  %v2962_v60 = vrot.slane %v2662_v12, %v4624_v51 }
 0x3f3   : > { %v3122_v54 = vsel %vm395_vm1, %v3114_v29, %v2942_v11  ;;  %v3123_v28 = vsel %vm395_vm1, %v3115_v46, %v2946_v13  ;;  %v3125_v8 = vsel %vm395_vm1, %v3117_v41, %v2954_v14  ;;  %v2696_v6 = vrot.slane %v2680_v9, %v4619_v55 }
 0x3f4   : > { %v2966_v22 = vrot.slane %v2664_v24, %v4624_v51  ;;  %v3124_v52 = vsel %vm395_vm1, %v3116_v59, %v2950_v16  ;;  %v3126_v31 = vsel %vm395_vm1, %v3118_v63, %v2958_v25  ;;  %v3127_v15 = vsel %vm395_vm1, %v3119_v19, %v2962_v60 }
 0x3f5   : > { %v2703_v18 = vrot.slane %v2681_v4, %v4619_v55  ;;  %v2710_v30 = vrot.slane %v2682_v5, %v4619_v55  ;;  %v2711_v32 = vcombine.high %v2689_v39, %v2689_v39  ;;  %v2712_v33 = vcombine.high %v2696_v6, %v2696_v6 }
 0x3f6   : > { %v3128_v47 = vsel %vm395_vm1, %v3120_v17, %v2966_v22  ;;  %v2978_v37 = vrot.slane %v2689_v39, %v4624_v51  ;;  %v2994_v40 = vrot.slane %v2696_v6, %v4624_v51  ;;  %v2329_v36 = vsel %vm2327_vm11, %v2324_v27, %v2328_v1 }
 0x3f7   : > { %v2713_v41 = vcombine.high %v2703_v18, %v2703_v18  ;;  %v2714_v42 = vcombine.high %v2710_v30, %v2710_v30  ;;  %v2982_v44 = vrot.slane %v2703_v18, %v4624_v51  ;;  %v2986_v29 = vrot.slane %v2711_v32, %v4624_v51 }
 0x3f8   : > { %v2998_v46 = vrot.slane %v2710_v30, %v4624_v51  ;;  %v3002_v63 = vrot.slane %v2712_v33, %v4624_v51  ;;  %v3130_v19 = vsel %vm3129_vm10, %v3121_v21, %v2978_v37  ;;  %v3134_v50 = vsel %vm3129_vm10, %v3125_v8, %v2994_v40 }
 0x3f9   : > { %v2990_v59 = vrot.slane %v2713_v41, %v4624_v51  ;;  %v3006_v17 = vrot.slane %v2714_v42, %v4624_v51  ;;  %v3131_v62 = vsel %vm3129_vm10, %v3122_v54, %v2982_v44  ;;  %v3132_v38 = vsel %vm3129_vm10, %v3123_v28, %v2986_v29 }
 0x3fa   : > { %v3135_v56 = vsel %vm3129_vm10, %v3126_v31, %v2998_v46  ;;  %v3136_v35 = vsel %vm3129_vm10, %v3127_v15, %v3002_v63  ;;  %v2716_v57 = vcombine.high %v2329_v36, %v2329_v36  ;;  %v2723_v58 = vrot.slane %v2329_v36, %v4619_v55 }
 0x3fb   : > { %v3133_v27 = vsel %vm3129_vm10, %v3124_v52, %v2990_v59  ;;  %v3137_v61 = vsel %vm3129_vm10, %v3128_v47, %v3006_v17 }
 0x3fc   : > { %v2730_v48 = vrot.slane %v2716_v57, %v4619_v55  ;;  %v2731_v53 = vcombine.high %v2723_v58, %v2723_v58  ;;  %v2739_v49 = vrot.slane %v2723_v58, %v4619_v55 }
 0x3fe   : > { %v2732_v34 = vcombine.high %v2730_v48, %v2730_v48  ;;  %v2746_v26 = vrot.slane %v2730_v48, %v4619_v55  ;;  %v2753_v45 = vrot.slane %v2731_v53, %v4619_v55  ;;  %v2761_v1 = vcombine.high %v2739_v49, %v2739_v49 }
 0x3ff   : > { %v3018_v20 = vrot.slane %v2739_v49, %v4624_v51 }
 0x400   : > { %v2760_v7 = vrot.slane %v2732_v34, %v4619_v55  ;;  %v2762_v2 = vcombine.high %v2746_v26, %v2746_v26  ;;  %v2763_v43 = vcombine.high %v2753_v45, %v2753_v45  ;;  %v3022_v3 = vrot.slane %v2753_v45, %v4624_v51 }
 0x401   : > { %v3026_v9 = vrot.slane %v2761_v1, %v4624_v51  ;;  %v3034_v4 = vrot.slane %v2746_v26, %v4624_v51  ;;  %v3138_v39 = vsel %vm434_vm4, %v3130_v19, %v3018_v20 }
 0x402   : > { %v2764_v0 = vcombine.high %v2760_v7, %v2760_v7  ;;  %v3030_v12 = vrot.slane %v2763_v43, %v4624_v51  ;;  %v3038_v10 = vrot.slane %v2760_v7, %v4624_v51  ;;  %v3042_v11 = vrot.slane %v2762_v2, %v4624_v51 }
 0x403   : > { %v3139_v13 = vsel %vm434_vm4, %v3131_v62, %v3022_v3  ;;  %v3140_v14 = vsel %vm434_vm4, %v3132_v38, %v3026_v9  ;;  %v3142_v21 = vsel %vm434_vm4, %v3134_v50, %v3034_v4 }
 0x404   : > { %v3046_v5 = vrot.slane %v2764_v0, %v4624_v51  ;;  %v3141_v24 = vsel %vm434_vm4, %v3133_v27, %v3030_v12  ;;  %v3143_v16 = vsel %vm434_vm4, %v3135_v56, %v3038_v10  ;;  %v3144_v25 = vsel %vm434_vm4, %v3136_v35, %v3042_v11 }
 0x406   : > { %v3145_v60 = vsel %vm434_vm4, %v3137_v61, %v3046_v5  ;;  %vm3146_vm4 = vcmask 1046528  }
 0x42e   : > { %v2400_v54 = vpop.f32.mrb[42].mxu1 }
 0x42f   : > { %v2401_v28 = vadd.f32 %v2400_v54, %v4614_v23  ;;  %v3593_v8 = vpop.f32.mrb[43].mxu1 }
 0x431   : > { %vm2404_vm1 = vcmp.ge.f32.partialorder %v2401_v28, 0.0  ;;  %v2405_v6 = vmul.f32 0.01, %v2401_v28 }
 0x433   : > { %v2406_v22 = vsel %vm2404_vm1, %v2401_v28, %v2405_v6 }
 0x434   : > { %v2766_v52 = vcombine.high %v2406_v22, %v2406_v22  ;;  %v2773_v31 = vrot.slane %v2406_v22, %v4619_v55 }
 0x436   : > { %v2780_v15 = vrot.slane %v2766_v52, %v4619_v55  ;;  %v2781_v18 = vcombine.high %v2773_v31, %v2773_v31  ;;  %v2789_v30 = vrot.slane %v2773_v31, %v4619_v55 }
 0x438   : > { %v2782_v32 = vcombine.high %v2780_v15, %v2780_v15  ;;  %v2796_v23 = vrot.slane %v2780_v15, %v4619_v55  ;;  %v2803_v33 = vrot.slane %v2781_v18, %v4619_v55  ;;  %v2811_v47 = vcombine.high %v2789_v30, %v2789_v30 }
 0x439   : > { %v3058_v37 = vrot.slane %v2789_v30, %v4624_v51 }
 0x43a   : > { %v2810_v40 = vrot.slane %v2782_v32, %v4619_v55  ;;  %v2812_v36 = vcombine.high %v2796_v23, %v2796_v23  ;;  %v2813_v41 = vcombine.high %v2803_v33, %v2803_v33  ;;  %v3062_v42 = vrot.slane %v2803_v33, %v4624_v51 }
 0x43b   : > { %v3066_v44 = vrot.slane %v2811_v47, %v4624_v51  ;;  %v3074_v29 = vrot.slane %v2796_v23, %v4624_v51  ;;  %v3147_v46 = vsel %vm3146_vm4, %v3138_v39, %v3058_v37 }
 0x43c   : > { %v2814_v63 = vcombine.high %v2810_v40, %v2810_v40  ;;  %v3070_v19 = vrot.slane %v2813_v41, %v4624_v51  ;;  %v3078_v50 = vrot.slane %v2810_v40, %v4624_v51  ;;  %v3082_v55 = vrot.slane %v2812_v36, %v4624_v51  ;;  %3156 = vst.msk [vmem:[%s327_s27] sm:$0xff] %vm3155_vm12, %v3147_v46 }
 0x43d   : > { %v3148_v59 = vsel %vm3146_vm4, %v3139_v13, %v3062_v42  ;;  %v3149_v17 = vsel %vm3146_vm4, %v3140_v14, %v3066_v44  ;;  %v3151_v62 = vsel %vm3146_vm4, %v3142_v21, %v3074_v29 }
 0x43e   : > { %v3086_v38 = vrot.slane %v2814_v63, %v4624_v51  ;;  %v3150_v56 = vsel %vm3146_vm4, %v3141_v24, %v3070_v19  ;;  %v3152_v35 = vsel %vm3146_vm4, %v3143_v16, %v3078_v50  ;;  %v3153_v57 = vsel %vm3146_vm4, %v3144_v25, %v3082_v55  ;;  %3157 = vst.msk [vmem:[%s327_s27 + $0x8] sm:$0xff] %vm3155_vm12, %v3148_v59 }
 0x43f   : > { %3158 = vst.msk [vmem:[%s327_s27 + $0x10] sm:$0xff] %vm3155_vm12, %v3149_v17  ;;  %3160 = vst.msk [vmem:[%s327_s27 + $0x20] sm:$0xff] %vm3155_vm12, %v3151_v62 }
 0x440   : > { %3159 = vst.msk [vmem:[%s327_s27 + $0x18] sm:$0xff] %vm3155_vm12, %v3150_v56  ;;  %3161 = vst.msk [vmem:[%s327_s27 + $0x28] sm:$0xff] %vm3155_vm12, %v3152_v35  ;;  %v3154_v51 = vsel %vm3146_vm4, %v3145_v60, %v3086_v38 }
 0x441   : > { %3162 = vst.msk [vmem:[%s327_s27 + $0x30] sm:$0xff] %vm3155_vm12, %v3153_v57  ;;  %3163 = vst.msk [vmem:[%s327_s27 + $0x38] sm:$0xff] %vm3155_vm12, %v3154_v51 }
 0x442   : > { %3761 = shalt.err (!%p3758_p9)
}
 0x443   : > { %s3762_s22 = scalar_lea.hbm %s4795_s18, 1024  ;;  %s3766_s9 = scalar_lea.hbm %s4872_s7, 4096 }
 0x444   : > { %p3763_p10 = scmp.ne.s32.totalorder %s4795_s18, %s3762_s22  ;;  %p3767_p13 = scmp.lt.u32.totalorder %s4795_s18, %s4872_s7 }
 0x445   : > { %p3768_p0 = scmp.lt.u32.totalorder %s3766_s9, %s3762_s22  ;;  %p3770_p2 = scmp.lt.u32.totalorder %s3762_s22, %s4795_s18 }
 0x446   : > { %p3764_p11 = pnand %p3763_p10, %p3951_p3 }
 0x447   : > { %p3769_p1 = por %p3768_p0, %p3767_p13 }
 0x448   : > { %p3765_p12 = pneg %p3764_p11 }
 0x449   : > { %p3771_p4 = por %p3770_p2, %p3769_p1 }
 0x44b   : > { %p3772_p5 = pnand %p3771_p4, %p3765_p12 }
 0x44d   : > { %3775 = shalt.err (!%p3772_p5)
}
 0x44e   : > { %s3857_s21 = smov 128   ;;  %s3858_s13 = smov 256  }
 0x44f   : > { %s3859_s16 = smov 8  }
 0x450   : > { %3643 = dma.vmem_to_hbm [thread:$0]  (%p3951_p3), %s4804_s23, 1024, %s4795_s18, %s4813_s20, %s3857_s21, %s3858_s13, %s3859_s16  }
 0x451 PF: > { %p3649_p6 = scmp.ge.s32.totalorder %s3842_s8, 2  ;;  %s3194_s28 = sand.u32 1, %s3814_s24  }
 0x452   : > { %s3195_s22 = scalar_lea.sflag [#allocation3], %s3194_s28 }
 0x453   : > { %p3646_p7 = pnand %p3649_p6, %p3960_p8 }
 0x455   : > { %3809 = dma.done.wait (!%p3646_p7), %s3195_s22, 1024  }
 0x456   : > { %3811 = vsyncadd (!%p3646_p7), %s3195_s22, 4294966272  ;;  %s20_s8 = sadd.s32 1, %s3842_s8   ;;  %s4875_s24 = smov %s3818_s25 }
 0x457   : > { %p17_p9 = scmp.ge.s32.totalorder %s20_s8, 6   ;;  %s4876_s25 = smov %s3822_s26 }
 0x458   : > { %s4877_s26 = smov %s3969_s19  ;;  %s4878_s27 = smov %s3834_s29 }
 0x459   : > { %s4879_s28 = smov %s3838_s30  ;;  %s4880_s29 = smov %s4883_s11 }
 0x45a   : > { %s4881_s30 = smov %s4887_s12  ;;  %19 = sbr.rel (!%p17_p9) target bundleno = 5 (0x5), region = 86 }
 0x461   :  { %3200 = vsyncpa [#allocation3], 1 }
 0x462   :  { %3202 = vsyncpa [#allocation3 + $0x1], 1 }

</bundles_post_ra>
